<compile_context>
chip_gen: v6e
topology: v6e:2x2x1
jax: 0.10.0
libtpu: 0.0.40
codegen_flags: <defaults>
</compile_context>

<pallas_src>
import functools

import jax
import jax.numpy as jnp
from jax.experimental import pallas as pl
from jax.experimental.pallas import tpu as pltpu


def _round_up(x, m):
    return ((x + m - 1) // m) * m


def _pad_gate_cols(w, h, h_pad):
    """Pad each of the 4 interleaved gate blocks (last dim = 4*h) to width h_pad."""
    if h_pad == h:
        return w
    lead = w.shape[:-1]
    w4 = w.reshape(lead + (4, h))
    pad = [(0, 0)] * (len(lead) + 1) + [(0, h_pad - h)]
    return jnp.pad(w4, pad).reshape(lead + (4 * h_pad,))


# ------------------------------------------------------------------------------
# Pallas kernel: T_BLK LSTM steps per grid iteration, state carried in VMEM
# ------------------------------------------------------------------------------
def _lstm_recurrence_kernel(gx_ref, whh_ref, h0_ref, c0_ref, out_ref, h_scr, c_scr):
    # Grid = (batch_blocks, time_blocks); time is the inner sequential axis.
    @pl.when(pl.program_id(1) == 0)
    def _():
        # New batch block: (re)load the initial hidden state.
        h_scr[...] = h0_ref[...]
        c_scr[...] = c0_ref[...]

    h_pad = h_scr.shape[-1]          # lane-aligned hidden size (multiple of 128)
    t_blk = gx_ref.shape[0]          # timesteps handled by this grid step (static)

    def sigmoid(x):
        # 0.5*tanh(0.5*x)+0.5: a single EUP pass + cheap VPU ops instead of exp+recip.
        return 0.5 * jnp.tanh(0.5 * x) + 0.5

    # h/c carried as values across the statically-unrolled steps; scratch is
    # touched only once per grid step (init above, writeback below).
    h = h_scr[...]
    c = c_scr[...]
    for i in range(t_blk):           # static indices -> plain offset loads/stores
        # Recurrent matmul on the MXU (bf16 operands, f32 accumulation) plus the
        # precomputed (bf16) input projection for this timestep.
        gates = gx_ref[i].astype(jnp.float32) + jnp.dot(
            h.astype(whh_ref.dtype), whh_ref[...],
            preferred_element_type=jnp.float32)

        # Gate blocks are lane-aligned (each H_pad columns wide) -> free slicing.
        i_g = sigmoid(gates[:, 0 * h_pad:1 * h_pad])
        f_g = sigmoid(gates[:, 1 * h_pad:2 * h_pad])
        g_g = jnp.tanh(gates[:, 2 * h_pad:3 * h_pad])
        o_g = sigmoid(gates[:, 3 * h_pad:4 * h_pad])

        c = f_g * c + i_g * g_g
        h = o_g * jnp.tanh(c)

        # Lane-dense store directly into the (bsz, seq, hidden) output layout.
        out_ref[:, i, :] = h.astype(out_ref.dtype)

    h_scr[...] = h
    c_scr[...] = c


def _lstm_decoder_pallas(gates_x, w_hh, h0, c0, hidden_size, hidden_pad, *,
                         t_blk=16, compute_dtype=jnp.bfloat16,
                         out_dtype=jnp.float32, min_batch_blocks=1,
                         vmem_budget_bytes=48 * 1024 * 1024):
    """Run the sequential LSTM recurrence.

    gates_x: (seq_len, bsz, 4*hidden_pad), already contains x_t @ W_ih + bias
             (+ encoder contribution); gate blocks padded to hidden_pad lanes.
    w_hh:    (hidden, 4*hidden) recurrent weights (gate order i, f, g, o).
    h0, c0:  (bsz, hidden) initial state.
    Returns: (bsz, seq_len, hidden) hidden states in out_dtype.
    """
    seq_len, bsz, four_hp = gates_x.shape
    H, H_pad = hidden_size, hidden_pad
    assert four_hp == 4 * H_pad

    # Batch block: as close to the MXU row dimension as the batch allows
    # (amortizes the weight-stationary W_hh push over more LHS rows).
    B_BLK = min(_round_up(bsz, 8), 256)
    # Optionally force >=2 batch blocks (v7x: occupy both TensorCores).
    if min_batch_blocks > 1 and bsz >= 16:
        while _round_up(bsz, B_BLK) // B_BLK < min_batch_blocks and B_BLK > 8:
            B_BLK = max(8, _round_up(B_BLK // 2, 8))
    # Time block is the second-to-last dim of the output block -> multiple of 8.
    T_BLK = _round_up(max(1, min(t_blk, seq_len)), 8)

    gx_isz = gates_x.dtype.itemsize
    out_isz = jnp.dtype(out_dtype).itemsize
    w_isz = jnp.dtype(compute_dtype).itemsize

    def block_bytes(tb, bb):
        gx_b = tb * bb * 4 * H_pad * gx_isz          # double-buffered
        out_b = bb * tb * H_pad * out_isz            # double-buffered
        whh_b = H_pad * 4 * H_pad * w_isz            # double-buffered (const index)
        st_b = bb * H_pad * 4                        # h0/c0 blocks + h/c scratch
        return 2 * gx_b + 2 * out_b + 2 * whh_b + 6 * st_b

    # Shrink tiles to a conservative VMEM budget (fits v7x's 64 MiB VMEM):
    # shrink T_BLK first (keeps MXU row utilization), then B_BLK.
    while block_bytes(T_BLK, B_BLK) > vmem_budget_bytes and T_BLK > 8:
        T_BLK = max(8, _round_up(T_BLK // 2, 8))
    while block_bytes(T_BLK, B_BLK) > vmem_budget_bytes and B_BLK > 8:
        B_BLK = max(8, _round_up(B_BLK // 2, 8))

    B_pad = _round_up(bsz, B_BLK)
    seq_pad = _round_up(seq_len, T_BLK)

    # Pad time / batch. Padded gate rows stay zero -> padded (h, c) lanes / rows
    # stay zero; padded trailing timesteps are sliced off below.
    gx = jnp.pad(gates_x, ((0, seq_pad - seq_len), (0, B_pad - bsz), (0, 0)))

    whh = w_hh.astype(jnp.float32).reshape(H, 4, H)
    whh = jnp.pad(whh, ((0, H_pad - H), (0, 0), (0, H_pad - H)))
    whh = whh.reshape(H_pad, 4 * H_pad).astype(compute_dtype)

    def pad_state(s):
        return jnp.pad(s.astype(jnp.float32), ((0, B_pad - bsz), (0, H_pad - H)))
    h0p, c0p = pad_state(h0), pad_state(c0)

    grid = (B_pad // B_BLK, seq_pad // T_BLK)

    # VMEM limit derived from actual block bytes (2x slack for tile padding),
    # never the full physical VMEM of any generation (v7x has only 64 MiB).
    vmem_limit = int(min(max(2 * block_bytes(T_BLK, B_BLK), 32 << 20), 56 << 20))

    out = pl.pallas_call(
        _lstm_recurrence_kernel,
        out_shape=jax.ShapeDtypeStruct((B_pad, seq_pad, H_pad), out_dtype),
        grid_spec=pltpu.PrefetchScalarGridSpec(
            num_scalar_prefetch=0,
            grid=grid,
            in_specs=[
                # Per-time-block slab of precomputed (bf16) input gates.
                pl.BlockSpec((T_BLK, B_BLK, 4 * H_pad), lambda b, t: (t, b, 0)),
                # Recurrent weights: constant block index -> fetched once, stays
                # VMEM-resident across the whole grid.
                # TODO(synk): pipeline_mode=pl.Buffered(1) would drop the idle
                # second weight buffer (worth ~8 MiB at H_pad=1024 on v7x).
                pl.BlockSpec((H_pad, 4 * H_pad), lambda b, t: (0, 0)),
                # Initial (h, c) for this batch block.
                pl.BlockSpec((B_BLK, H_pad), lambda b, t: (b, 0)),
                pl.BlockSpec((B_BLK, H_pad), lambda b, t: (b, 0)),
            ],
            # Output written directly in (bsz, seq, hidden) layout.
            out_specs=pl.BlockSpec((B_BLK, T_BLK, H_pad), lambda b, t: (b, t, 0)),
            scratch_shapes=[
                pltpu.VMEM((B_BLK, H_pad), jnp.float32),  # h carry
                pltpu.VMEM((B_BLK, H_pad), jnp.float32),  # c carry
            ],
        ),
        compiler_params=pltpu.CompilerParams(
            # Batch blocks are independent (megacore / 2-TC shardable); the time
            # axis is the sequential recurrence.
            dimension_semantics=("parallel", "arbitrary"),
            vmem_limit_bytes=vmem_limit,
        ),
    )(gx, whh, h0p, c0p)

    return out[:bsz, :seq_len, :H]


# ------------------------------------------------------------------------------
# RNNDecoderBase.forward (glue in plain JAX, recurrence in the Pallas kernel)
# ------------------------------------------------------------------------------
def rnn_decoder_forward(params, input_ids, encoder_hidden_states,
                        past_rnn_state=None, return_dict=False,
                        t_blk=16, compute_dtype=jnp.bfloat16,
                        gx_dtype=jnp.bfloat16, out_dtype=jnp.float32,
                        min_batch_blocks=1):
    assert input_ids.ndim == 2, "(bsz, seq_len)"
    bsz, seq_len = input_ids.shape
    hidden_size = params["w_hh"].shape[0]
    embed_dim = params["embedding"].shape[1]
    H_pad = _round_up(hidden_size, 128)

    # get_mean_video_features: mean over (list of) encoder outputs and over time.
    enc = encoder_hidden_states
    if not isinstance(enc, (list, tuple)):
        enc = [enc]
    mean_v = jnp.stack(enc, axis=0).mean(axis=0).mean(axis=1)          # (bsz, enc_dim)

    # Embedding lookup (get_input_embeddings).
    emb = params["embedding"][input_ids].astype(jnp.float32)           # (bsz, seq, embed)

    # Hoisted input projection.  W_ih is split into token / encoder halves so
    # the constant-over-time encoder term is computed once per batch row; gate
    # columns are padded to lane-aligned H_pad blocks BEFORE the matmul, and the
    # einsum emits time-major (seq, bsz, 4*H_pad) directly -> no wrapper
    # transpose pass over the big activation tensor.
    # NOTE: when porting PyTorch LSTMCell weights, params["bias"] must already
    # hold bias_ih + bias_hh summed.
    w_ih = params["w_ih"].astype(jnp.float32)
    bias = params["bias"].reshape(-1).astype(jnp.float32)
    w_emb = _pad_gate_cols(w_ih[:embed_dim], hidden_size, H_pad)
    w_enc = _pad_gate_cols(w_ih[embed_dim:], hidden_size, H_pad)
    bias_p = _pad_gate_cols(bias, hidden_size, H_pad)

    gates_tok = jnp.einsum("bte,eg->tbg", emb, w_emb,
                           preferred_element_type=jnp.float32)         # (seq, bsz, 4*H_pad)
    gates_static = mean_v.astype(jnp.float32) @ w_enc + bias_p         # (bsz, 4*H_pad)
    gates_x = (gates_tok + gates_static[None]).astype(gx_dtype)        # bf16 HBM stream

    # init_decoder_rnn_hidden_states: None -> zeros; otherwise warm-start.
    if past_rnn_state is None:
        h0 = jnp.zeros((bsz, hidden_size), jnp.float32)
        c0 = h0
    else:
        h0, c0 = past_rnn_state
        h0 = jnp.reshape(h0, (bsz, hidden_size)).astype(jnp.float32)
        c0 = jnp.reshape(c0, (bsz, hidden_size)).astype(jnp.float32)

    hidden_states = _lstm_decoder_pallas(
        gates_x, params["w_hh"], h0, c0, hidden_size, H_pad,
        t_blk=t_blk, compute_dtype=compute_dtype, out_dtype=out_dtype,
        min_batch_blocks=min_batch_blocks)                              # (bsz, seq, hidden)

    cross_attentions = None                                             # base step has no attention
    # postprocessing: identity; present_key_value_state = None.
    # TODO(synk): the final (h, c) state is not returned from the kernel (padded
    # trailing timesteps would need masking first); only needed for the
    # return_dict past_key_values field of the PyTorch base class.
    if not return_dict:
        return hidden_states, cross_attentions
    return {"last_hidden_state": hidden_states,
            "hidden_states": hidden_states,
            "attentions": None,
            "cross_attentions": cross_attentions,
            "past_key_values": None}


# ------------------------------------------------------------------------------
# Pure-JAX reference (lax.scan LSTM, full f32) for correctness checks
# ------------------------------------------------------------------------------
def _reference(params, input_ids, encoder_hidden_states):
    bsz, seq_len = input_ids.shape
    hidden_size = params["w_hh"].shape[0]
    mean_v = encoder_hidden_states.mean(axis=1)
    emb = params["embedding"][input_ids]
    x = jnp.concatenate(
        [emb, jnp.broadcast_to(mean_v[:, None, :], (bsz, seq_len, mean_v.shape[-1]))],
        axis=-1,
    )
    x = jnp.transpose(x, (1, 0, 2)).astype(jnp.float32)

    def step(carry, x_t):
        h, c = carry
        gates = x_t @ params["w_ih"] + h @ params["w_hh"] + params["bias"][0]
        i = jax.nn.sigmoid(gates[:, 0 * hidden_size:1 * hidden_size])
        f = jax.nn.sigmoid(gates[:, 1 * hidden_size:2 * hidden_size])
        g = jnp.tanh(gates[:, 2 * hidden_size:3 * hidden_size])
        o = jax.nn.sigmoid(gates[:, 3 * hidden_size:4 * hidden_size])
        c = f * c + i * g
        h = o * jnp.tanh(c)
        return (h, c), h

    h0 = jnp.zeros((bsz, hidden_size), jnp.float32)
    (_, _), hs = jax.lax.scan(step, (h0, h0), x)
    return jnp.transpose(hs, (1, 0, 2))


# ------------------------------------------------------------------------------
# Deterministic parameter init + demo
# ------------------------------------------------------------------------------
def init_params(key, vocab_size, embed_dim, enc_dim, hidden_size):
    k1, k2, k3, k4 = jax.random.split(key, 4)
    input_dim = embed_dim + enc_dim
    scale = 0.1
    return {
        "embedding": scale * jax.random.normal(k1, (vocab_size, embed_dim), jnp.float32),
        "w_ih": scale * jax.random.normal(k2, (input_dim, 4 * hidden_size), jnp.float32),
        "w_hh": scale * jax.random.normal(k3, (hidden_size, 4 * hidden_size), jnp.float32),
        "bias": scale * jax.random.normal(k4, (1, 4 * hidden_size), jnp.float32),
    }


if __name__ == "__main__":
    key = jax.random.PRNGKey(0)
    k_param, k_ids, k_enc, k_ids2, k_enc2 = jax.random.split(key, 5)

    vocab_size, embed_dim, enc_dim, hidden_size = 50, 32, 32, 32

    # --- check 1: canonical small shapes -------------------------------------
    bsz, seq_len, n_frames = 2, 8, 4
    params = init_params(k_param, vocab_size, embed_dim, enc_dim, hidden_size)
    input_ids = jax.random.randint(k_ids, (bsz, seq_len), 0, vocab_size)
    encoder_hidden_states = jax.random.normal(k_enc, (bsz, n_frames, enc_dim), jnp.float32)

    fwd = jax.jit(functools.partial(rnn_decoder_forward, params))
    hidden_states, cross_attentions = fwd(input_ids, encoder_hidden_states)
    hidden_states = jax.block_until_ready(hidden_states)

    ref = _reference(params, input_ids, encoder_hidden_states)
    assert hidden_states.shape == (bsz, seq_len, hidden_size)
    assert cross_attentions is None
    # bf16 recurrent matmul + bf16 gates_x stream -> slightly loosened tolerance.
    assert jnp.allclose(hidden_states, ref, atol=2e-2, rtol=2e-2), float(
        jnp.max(jnp.abs(hidden_states - ref)))

    # --- check 2: ragged shapes exercising time/batch padding & multi-block ---
    bsz2, seq_len2, n_frames2 = 3, 11, 5
    input_ids2 = jax.random.randint(k_ids2, (bsz2, seq_len2), 0, vocab_size)
    enc2 = jax.random.normal(k_enc2, (bsz2, n_frames2, enc_dim), jnp.float32)

    fwd2 = jax.jit(lambda ids, e: rnn_decoder_forward(params, ids, e, t_blk=4))
    hs2, _ = fwd2(input_ids2, enc2)
    hs2 = jax.block_until_ready(hs2)
    ref2 = _reference(params, input_ids2, enc2)
    assert hs2.shape == (bsz2, seq_len2, hidden_size)
    assert jnp.allclose(hs2, ref2, atol=2e-2, rtol=2e-2), float(
        jnp.max(jnp.abs(hs2 - ref2)))

    print("KERNEL_OK")
</pallas_src>

<mosaic_0001>
module attributes {stable_mosaic.version = 11 : i64} {
  func.func @_lstm_recurrence_kernel(%arg0: i32, %arg1: i32, %arg2: memref<8x8x512xbf16, #tpu.memory_space<vmem>>, %arg3: memref<128x512xbf16, #tpu.memory_space<vmem>>, %arg4: memref<8x128xf32, #tpu.memory_space<vmem>>, %arg5: memref<8x128xf32, #tpu.memory_space<vmem>>, %arg6: memref<8x8x128xf32, #tpu.memory_space<vmem>>, %arg7: memref<8x128xf32, #tpu.memory_space<vmem>>, %arg8: memref<8x128xf32, #tpu.memory_space<vmem>>) attributes {dimension_semantics = [#tpu.dimension_semantics<parallel>, #tpu.dimension_semantics<arbitrary>], iteration_bounds = array<i64: 1, 1>, scalar_prefetch = 0 : i64, scratch_operands = 2 : i64, tpu.core_type = #tpu.core_type<tc>, window_params = [{transform_indices = @transform_0, window_bounds = array<i64: 8, 8, 512>}, {pipeline_mode = #tpu.pipeline_mode<synchronous>, transform_indices = @transform_1, window_bounds = array<i64: 128, 512>}, {transform_indices = @transform_2, window_bounds = array<i64: 8, 128>}, {transform_indices = @transform_3, window_bounds = array<i64: 8, 128>}, {transform_indices = @transform_4, window_bounds = array<i64: 8, 8, 128>}]} {
    %c0_i32 = arith.constant 0 : i32
    %0 = arith.cmpi eq, %arg1, %c0_i32 : i32
    %1 = arith.extui %0 : i1 to i32
    %c0_i32_0 = arith.constant 0 : i32
    %2 = arith.cmpi ne, %1, %c0_i32_0 : i32
    scf.if %2 {
      %c0_144 = arith.constant 0 : index
      %c0_145 = arith.constant 0 : index
      %335 = vector.load %arg4[%c0_144, %c0_145] : memref<8x128xf32, #tpu.memory_space<vmem>>, vector<8x128xf32>
      %c0_146 = arith.constant 0 : index
      %c0_147 = arith.constant 0 : index
      %336 = vector.load %arg7[%c0_146, %c0_147] : memref<8x128xf32, #tpu.memory_space<vmem>>, vector<8x128xf32>
      tpu.vector_store %arg7[%c0_146, %c0_147], %335 {strides = array<i32>} : memref<8x128xf32, #tpu.memory_space<vmem>>, vector<8x128xf32>,
      %c0_148 = arith.constant 0 : index
      %c0_149 = arith.constant 0 : index
      %337 = vector.load %arg5[%c0_148, %c0_149] : memref<8x128xf32, #tpu.memory_space<vmem>>, vector<8x128xf32>
      %c0_150 = arith.constant 0 : index
      %c0_151 = arith.constant 0 : index
      %338 = vector.load %arg8[%c0_150, %c0_151] : memref<8x128xf32, #tpu.memory_space<vmem>>, vector<8x128xf32>
      tpu.vector_store %arg8[%c0_150, %c0_151], %337 {strides = array<i32>} : memref<8x128xf32, #tpu.memory_space<vmem>>, vector<8x128xf32>,
    } else {
    }
    %c0 = arith.constant 0 : index
    %c0_1 = arith.constant 0 : index
    %3 = vector.load %arg7[%c0, %c0_1] : memref<8x128xf32, #tpu.memory_space<vmem>>, vector<8x128xf32>
    %c0_2 = arith.constant 0 : index
    %c0_3 = arith.constant 0 : index
    %4 = vector.load %arg8[%c0_2, %c0_3] : memref<8x128xf32, #tpu.memory_space<vmem>>, vector<8x128xf32>
    %c0_4 = arith.constant 0 : index
    %c0_5 = arith.constant 0 : index
    %c0_6 = arith.constant 0 : index
    %5 = vector.load %arg2[%c0_4, %c0_5, %c0_6] : memref<8x8x512xbf16, #tpu.memory_space<vmem>>, vector<1x8x512xbf16>
    %6 = vector.shape_cast %5 : vector<1x8x512xbf16> to vector<8x512xbf16>
    %7 = arith.extf %6 : vector<8x512xbf16> to vector<8x512xf32>
    %8 = arith.truncf %3 : vector<8x128xf32> to vector<8x128xbf16>
    %c0_7 = arith.constant 0 : index
    %c0_8 = arith.constant 0 : index
    %9 = vector.load %arg3[%c0_7, %c0_8] : memref<128x512xbf16, #tpu.memory_space<vmem>>, vector<128x512xbf16>
    %cst = arith.constant dense<0.000000e+00> : vector<8x512xf32>
    %10 = tpu.matmul %8, %9, %cst {dimension_numbers = #tpu.dot_dimension_numbers<[1], [0], [0], [1], [0, 0, 1, 1], [], []>} : vector<8x128xbf16>, vector<128x512xbf16>, vector<8x512xf32> -> vector<8x512xf32>
    %11 = arith.addf %7, %10 : vector<8x512xf32>
    %12 = vector.extract_strided_slice %11 {offsets = [0, 0], sizes = [8, 128], strides = [1, 1]} : vector<8x512xf32> to vector<8x128xf32>
    %cst_9 = arith.constant 5.000000e-01 : f32
    %13 = vector.broadcast %cst_9 : f32 to vector<8x128xf32>
    %14 = arith.mulf %13, %12 : vector<8x128xf32>
    %15 = math.tanh %14 : vector<8x128xf32>
    %cst_10 = arith.constant 5.000000e-01 : f32
    %16 = vector.broadcast %cst_10 : f32 to vector<8x128xf32>
    %17 = arith.mulf %16, %15 : vector<8x128xf32>
    %cst_11 = arith.constant 5.000000e-01 : f32
    %18 = vector.broadcast %cst_11 : f32 to vector<8x128xf32>
    %19 = arith.addf %17, %18 : vector<8x128xf32>
    %20 = vector.extract_strided_slice %11 {offsets = [0, 128], sizes = [8, 128], strides = [1, 1]} : vector<8x512xf32> to vector<8x128xf32>
    %cst_12 = arith.constant 5.000000e-01 : f32
    %21 = vector.broadcast %cst_12 : f32 to vector<8x128xf32>
    %22 = arith.mulf %21, %20 : vector<8x128xf32>
    %23 = math.tanh %22 : vector<8x128xf32>
    %cst_13 = arith.constant 5.000000e-01 : f32
    %24 = vector.broadcast %cst_13 : f32 to vector<8x128xf32>
    %25 = arith.mulf %24, %23 : vector<8x128xf32>
    %cst_14 = arith.constant 5.000000e-01 : f32
    %26 = vector.broadcast %cst_14 : f32 to vector<8x128xf32>
    %27 = arith.addf %25, %26 : vector<8x128xf32>
    %28 = vector.extract_strided_slice %11 {offsets = [0, 256], sizes = [8, 128], strides = [1, 1]} : vector<8x512xf32> to vector<8x128xf32>
    %29 = math.tanh %28 : vector<8x128xf32>
    %30 = vector.extract_strided_slice %11 {offsets = [0, 384], sizes = [8, 128], strides = [1, 1]} : vector<8x512xf32> to vector<8x128xf32>
    %cst_15 = arith.constant 5.000000e-01 : f32
    %31 = vector.broadcast %cst_15 : f32 to vector<8x128xf32>
    %32 = arith.mulf %31, %30 : vector<8x128xf32>
    %33 = math.tanh %32 : vector<8x128xf32>
    %cst_16 = arith.constant 5.000000e-01 : f32
    %34 = vector.broadcast %cst_16 : f32 to vector<8x128xf32>
    %35 = arith.mulf %34, %33 : vector<8x128xf32>
    %cst_17 = arith.constant 5.000000e-01 : f32
    %36 = vector.broadcast %cst_17 : f32 to vector<8x128xf32>
    %37 = arith.addf %35, %36 : vector<8x128xf32>
    %38 = arith.mulf %27, %4 : vector<8x128xf32>
    %39 = arith.mulf %19, %29 : vector<8x128xf32>
    %40 = arith.addf %38, %39 : vector<8x128xf32>
    %41 = math.tanh %40 : vector<8x128xf32>
    %42 = arith.mulf %37, %41 : vector<8x128xf32>
    %c0_18 = arith.constant 0 : index
    %c0_19 = arith.constant 0 : index
    %c0_20 = arith.constant 0 : index
    %43 = vector.load %arg6[%c0_18, %c0_19, %c0_20] : memref<8x8x128xf32, #tpu.memory_space<vmem>>, vector<8x1x128xf32>
    %44 = vector.shape_cast %43 : vector<8x1x128xf32> to vector<8x128xf32>
    %45 = vector.shape_cast %42 : vector<8x128xf32> to vector<8x1x128xf32>
    tpu.vector_store %arg6[%c0_18, %c0_19, %c0_20], %45 {strides = array<i32>} : memref<8x8x128xf32, #tpu.memory_space<vmem>>, vector<8x1x128xf32>,
    %c1 = arith.constant 1 : index
    %c0_21 = arith.constant 0 : index
    %c0_22 = arith.constant 0 : index
    %46 = vector.load %arg2[%c1, %c0_21, %c0_22] : memref<8x8x512xbf16, #tpu.memory_space<vmem>>, vector<1x8x512xbf16>
    %47 = vector.shape_cast %46 : vector<1x8x512xbf16> to vector<8x512xbf16>
    %48 = arith.extf %47 : vector<8x512xbf16> to vector<8x512xf32>
    %49 = arith.truncf %42 : vector<8x128xf32> to vector<8x128xbf16>
    %c0_23 = arith.constant 0 : index
    %c0_24 = arith.constant 0 : index
    %50 = vector.load %arg3[%c0_23, %c0_24] : memref<128x512xbf16, #tpu.memory_space<vmem>>, vector<128x512xbf16>
    %cst_25 = arith.constant dense<0.000000e+00> : vector<8x512xf32>
    %51 = tpu.matmul %49, %50, %cst_25 {dimension_numbers = #tpu.dot_dimension_numbers<[1], [0], [0], [1], [0, 0, 1, 1], [], []>} : vector<8x128xbf16>, vector<128x512xbf16>, vector<8x512xf32> -> vector<8x512xf32>
    %52 = arith.addf %48, %51 : vector<8x512xf32>
    %53 = vector.extract_strided_slice %52 {offsets = [0, 0], sizes = [8, 128], strides = [1, 1]} : vector<8x512xf32> to vector<8x128xf32>
    %cst_26 = arith.constant 5.000000e-01 : f32
    %54 = vector.broadcast %cst_26 : f32 to vector<8x128xf32>
    %55 = arith.mulf %54, %53 : vector<8x128xf32>
    %56 = math.tanh %55 : vector<8x128xf32>
    %cst_27 = arith.constant 5.000000e-01 : f32
    %57 = vector.broadcast %cst_27 : f32 to vector<8x128xf32>
    %58 = arith.mulf %57, %56 : vector<8x128xf32>
    %cst_28 = arith.constant 5.000000e-01 : f32
    %59 = vector.broadcast %cst_28 : f32 to vector<8x128xf32>
    %60 = arith.addf %58, %59 : vector<8x128xf32>
    %61 = vector.extract_strided_slice %52 {offsets = [0, 128], sizes = [8, 128], strides = [1, 1]} : vector<8x512xf32> to vector<8x128xf32>
    %cst_29 = arith.constant 5.000000e-01 : f32
    %62 = vector.broadcast %cst_29 : f32 to vector<8x128xf32>
    %63 = arith.mulf %62, %61 : vector<8x128xf32>
    %64 = math.tanh %63 : vector<8x128xf32>
    %cst_30 = arith.constant 5.000000e-01 : f32
    %65 = vector.broadcast %cst_30 : f32 to vector<8x128xf32>
    %66 = arith.mulf %65, %64 : vector<8x128xf32>
    %cst_31 = arith.constant 5.000000e-01 : f32
    %67 = vector.broadcast %cst_31 : f32 to vector<8x128xf32>
    %68 = arith.addf %66, %67 : vector<8x128xf32>
    %69 = vector.extract_strided_slice %52 {offsets = [0, 256], sizes = [8, 128], strides = [1, 1]} : vector<8x512xf32> to vector<8x128xf32>
    %70 = math.tanh %69 : vector<8x128xf32>
    %71 = vector.extract_strided_slice %52 {offsets = [0, 384], sizes = [8, 128], strides = [1, 1]} : vector<8x512xf32> to vector<8x128xf32>
    %cst_32 = arith.constant 5.000000e-01 : f32
    %72 = vector.broadcast %cst_32 : f32 to vector<8x128xf32>
    %73 = arith.mulf %72, %71 : vector<8x128xf32>
    %74 = math.tanh %73 : vector<8x128xf32>
    %cst_33 = arith.constant 5.000000e-01 : f32
    %75 = vector.broadcast %cst_33 : f32 to vector<8x128xf32>
    %76 = arith.mulf %75, %74 : vector<8x128xf32>
    %cst_34 = arith.constant 5.000000e-01 : f32
    %77 = vector.broadcast %cst_34 : f32 to vector<8x128xf32>
    %78 = arith.addf %76, %77 : vector<8x128xf32>
    %79 = arith.mulf %68, %40 : vector<8x128xf32>
    %80 = arith.mulf %60, %70 : vector<8x128xf32>
    %81 = arith.addf %79, %80 : vector<8x128xf32>
    %82 = math.tanh %81 : vector<8x128xf32>
    %83 = arith.mulf %78, %82 : vector<8x128xf32>
    %c0_35 = arith.constant 0 : index
    %c1_36 = arith.constant 1 : index
    %c0_37 = arith.constant 0 : index
    %84 = vector.load %arg6[%c0_35, %c1_36, %c0_37] : memref<8x8x128xf32, #tpu.memory_space<vmem>>, vector<8x1x128xf32>
    %85 = vector.shape_cast %84 : vector<8x1x128xf32> to vector<8x128xf32>
    %86 = vector.shape_cast %83 : vector<8x128xf32> to vector<8x1x128xf32>
    tpu.vector_store %arg6[%c0_35, %c1_36, %c0_37], %86 {strides = array<i32>} : memref<8x8x128xf32, #tpu.memory_space<vmem>>, vector<8x1x128xf32>,
    %c2 = arith.constant 2 : index
    %c0_38 = arith.constant 0 : index
    %c0_39 = arith.constant 0 : index
    %87 = vector.load %arg2[%c2, %c0_38, %c0_39] : memref<8x8x512xbf16, #tpu.memory_space<vmem>>, vector<1x8x512xbf16>
    %88 = vector.shape_cast %87 : vector<1x8x512xbf16> to vector<8x512xbf16>
    %89 = arith.extf %88 : vector<8x512xbf16> to vector<8x512xf32>
    %90 = arith.truncf %83 : vector<8x128xf32> to vector<8x128xbf16>
    %c0_40 = arith.constant 0 : index
    %c0_41 = arith.constant 0 : index
    %91 = vector.load %arg3[%c0_40, %c0_41] : memref<128x512xbf16, #tpu.memory_space<vmem>>, vector<128x512xbf16>
    %cst_42 = arith.constant dense<0.000000e+00> : vector<8x512xf32>
    %92 = tpu.matmul %90, %91, %cst_42 {dimension_numbers = #tpu.dot_dimension_numbers<[1], [0], [0], [1], [0, 0, 1, 1], [], []>} : vector<8x128xbf16>, vector<128x512xbf16>, vector<8x512xf32> -> vector<8x512xf32>
    %93 = arith.addf %89, %92 : vector<8x512xf32>
    %94 = vector.extract_strided_slice %93 {offsets = [0, 0], sizes = [8, 128], strides = [1, 1]} : vector<8x512xf32> to vector<8x128xf32>
    %cst_43 = arith.constant 5.000000e-01 : f32
    %95 = vector.broadcast %cst_43 : f32 to vector<8x128xf32>
    %96 = arith.mulf %95, %94 : vector<8x128xf32>
    %97 = math.tanh %96 : vector<8x128xf32>
    %cst_44 = arith.constant 5.000000e-01 : f32
    %98 = vector.broadcast %cst_44 : f32 to vector<8x128xf32>
    %99 = arith.mulf %98, %97 : vector<8x128xf32>
    %cst_45 = arith.constant 5.000000e-01 : f32
    %100 = vector.broadcast %cst_45 : f32 to vector<8x128xf32>
    %101 = arith.addf %99, %100 : vector<8x128xf32>
    %102 = vector.extract_strided_slice %93 {offsets = [0, 128], sizes = [8, 128], strides = [1, 1]} : vector<8x512xf32> to vector<8x128xf32>
    %cst_46 = arith.constant 5.000000e-01 : f32
    %103 = vector.broadcast %cst_46 : f32 to vector<8x128xf32>
    %104 = arith.mulf %103, %102 : vector<8x128xf32>
    %105 = math.tanh %104 : vector<8x128xf32>
    %cst_47 = arith.constant 5.000000e-01 : f32
    %106 = vector.broadcast %cst_47 : f32 to vector<8x128xf32>
    %107 = arith.mulf %106, %105 : vector<8x128xf32>
    %cst_48 = arith.constant 5.000000e-01 : f32
    %108 = vector.broadcast %cst_48 : f32 to vector<8x128xf32>
    %109 = arith.addf %107, %108 : vector<8x128xf32>
    %110 = vector.extract_strided_slice %93 {offsets = [0, 256], sizes = [8, 128], strides = [1, 1]} : vector<8x512xf32> to vector<8x128xf32>
    %111 = math.tanh %110 : vector<8x128xf32>
    %112 = vector.extract_strided_slice %93 {offsets = [0, 384], sizes = [8, 128], strides = [1, 1]} : vector<8x512xf32> to vector<8x128xf32>
    %cst_49 = arith.constant 5.000000e-01 : f32
    %113 = vector.broadcast %cst_49 : f32 to vector<8x128xf32>
    %114 = arith.mulf %113, %112 : vector<8x128xf32>
    %115 = math.tanh %114 : vector<8x128xf32>
    %cst_50 = arith.constant 5.000000e-01 : f32
    %116 = vector.broadcast %cst_50 : f32 to vector<8x128xf32>
    %117 = arith.mulf %116, %115 : vector<8x128xf32>
    %cst_51 = arith.constant 5.000000e-01 : f32
    %118 = vector.broadcast %cst_51 : f32 to vector<8x128xf32>
    %119 = arith.addf %117, %118 : vector<8x128xf32>
    %120 = arith.mulf %109, %81 : vector<8x128xf32>
    %121 = arith.mulf %101, %111 : vector<8x128xf32>
    %122 = arith.addf %120, %121 : vector<8x128xf32>
    %123 = math.tanh %122 : vector<8x128xf32>
    %124 = arith.mulf %119, %123 : vector<8x128xf32>
    %c0_52 = arith.constant 0 : index
    %c2_53 = arith.constant 2 : index
    %c0_54 = arith.constant 0 : index
    %125 = vector.load %arg6[%c0_52, %c2_53, %c0_54] : memref<8x8x128xf32, #tpu.memory_space<vmem>>, vector<8x1x128xf32>
    %126 = vector.shape_cast %125 : vector<8x1x128xf32> to vector<8x128xf32>
    %127 = vector.shape_cast %124 : vector<8x128xf32> to vector<8x1x128xf32>
    tpu.vector_store %arg6[%c0_52, %c2_53, %c0_54], %127 {strides = array<i32>} : memref<8x8x128xf32, #tpu.memory_space<vmem>>, vector<8x1x128xf32>,
    %c3 = arith.constant 3 : index
    %c0_55 = arith.constant 0 : index
    %c0_56 = arith.constant 0 : index
    %128 = vector.load %arg2[%c3, %c0_55, %c0_56] : memref<8x8x512xbf16, #tpu.memory_space<vmem>>, vector<1x8x512xbf16>
    %129 = vector.shape_cast %128 : vector<1x8x512xbf16> to vector<8x512xbf16>
    %130 = arith.extf %129 : vector<8x512xbf16> to vector<8x512xf32>
    %131 = arith.truncf %124 : vector<8x128xf32> to vector<8x128xbf16>
    %c0_57 = arith.constant 0 : index
    %c0_58 = arith.constant 0 : index
    %132 = vector.load %arg3[%c0_57, %c0_58] : memref<128x512xbf16, #tpu.memory_space<vmem>>, vector<128x512xbf16>
    %cst_59 = arith.constant dense<0.000000e+00> : vector<8x512xf32>
    %133 = tpu.matmul %131, %132, %cst_59 {dimension_numbers = #tpu.dot_dimension_numbers<[1], [0], [0], [1], [0, 0, 1, 1], [], []>} : vector<8x128xbf16>, vector<128x512xbf16>, vector<8x512xf32> -> vector<8x512xf32>
    %134 = arith.addf %130, %133 : vector<8x512xf32>
    %135 = vector.extract_strided_slice %134 {offsets = [0, 0], sizes = [8, 128], strides = [1, 1]} : vector<8x512xf32> to vector<8x128xf32>
    %cst_60 = arith.constant 5.000000e-01 : f32
    %136 = vector.broadcast %cst_60 : f32 to vector<8x128xf32>
    %137 = arith.mulf %136, %135 : vector<8x128xf32>
    %138 = math.tanh %137 : vector<8x128xf32>
    %cst_61 = arith.constant 5.000000e-01 : f32
    %139 = vector.broadcast %cst_61 : f32 to vector<8x128xf32>
    %140 = arith.mulf %139, %138 : vector<8x128xf32>
    %cst_62 = arith.constant 5.000000e-01 : f32
    %141 = vector.broadcast %cst_62 : f32 to vector<8x128xf32>
    %142 = arith.addf %140, %141 : vector<8x128xf32>
    %143 = vector.extract_strided_slice %134 {offsets = [0, 128], sizes = [8, 128], strides = [1, 1]} : vector<8x512xf32> to vector<8x128xf32>
    %cst_63 = arith.constant 5.000000e-01 : f32
    %144 = vector.broadcast %cst_63 : f32 to vector<8x128xf32>
    %145 = arith.mulf %144, %143 : vector<8x128xf32>
    %146 = math.tanh %145 : vector<8x128xf32>
    %cst_64 = arith.constant 5.000000e-01 : f32
    %147 = vector.broadcast %cst_64 : f32 to vector<8x128xf32>
    %148 = arith.mulf %147, %146 : vector<8x128xf32>
    %cst_65 = arith.constant 5.000000e-01 : f32
    %149 = vector.broadcast %cst_65 : f32 to vector<8x128xf32>
    %150 = arith.addf %148, %149 : vector<8x128xf32>
    %151 = vector.extract_strided_slice %134 {offsets = [0, 256], sizes = [8, 128], strides = [1, 1]} : vector<8x512xf32> to vector<8x128xf32>
    %152 = math.tanh %151 : vector<8x128xf32>
    %153 = vector.extract_strided_slice %134 {offsets = [0, 384], sizes = [8, 128], strides = [1, 1]} : vector<8x512xf32> to vector<8x128xf32>
    %cst_66 = arith.constant 5.000000e-01 : f32
    %154 = vector.broadcast %cst_66 : f32 to vector<8x128xf32>
    %155 = arith.mulf %154, %153 : vector<8x128xf32>
    %156 = math.tanh %155 : vector<8x128xf32>
    %cst_67 = arith.constant 5.000000e-01 : f32
    %157 = vector.broadcast %cst_67 : f32 to vector<8x128xf32>
    %158 = arith.mulf %157, %156 : vector<8x128xf32>
    %cst_68 = arith.constant 5.000000e-01 : f32
    %159 = vector.broadcast %cst_68 : f32 to vector<8x128xf32>
    %160 = arith.addf %158, %159 : vector<8x128xf32>
    %161 = arith.mulf %150, %122 : vector<8x128xf32>
    %162 = arith.mulf %142, %152 : vector<8x128xf32>
    %163 = arith.addf %161, %162 : vector<8x128xf32>
    %164 = math.tanh %163 : vector<8x128xf32>
    %165 = arith.mulf %160, %164 : vector<8x128xf32>
    %c0_69 = arith.constant 0 : index
    %c3_70 = arith.constant 3 : index
    %c0_71 = arith.constant 0 : index
    %166 = vector.load %arg6[%c0_69, %c3_70, %c0_71] : memref<8x8x128xf32, #tpu.memory_space<vmem>>, vector<8x1x128xf32>
    %167 = vector.shape_cast %166 : vector<8x1x128xf32> to vector<8x128xf32>
    %168 = vector.shape_cast %165 : vector<8x128xf32> to vector<8x1x128xf32>
    tpu.vector_store %arg6[%c0_69, %c3_70, %c0_71], %168 {strides = array<i32>} : memref<8x8x128xf32, #tpu.memory_space<vmem>>, vector<8x1x128xf32>,
    %c4 = arith.constant 4 : index
    %c0_72 = arith.constant 0 : index
    %c0_73 = arith.constant 0 : index
    %169 = vector.load %arg2[%c4, %c0_72, %c0_73] : memref<8x8x512xbf16, #tpu.memory_space<vmem>>, vector<1x8x512xbf16>
    %170 = vector.shape_cast %169 : vector<1x8x512xbf16> to vector<8x512xbf16>
    %171 = arith.extf %170 : vector<8x512xbf16> to vector<8x512xf32>
    %172 = arith.truncf %165 : vector<8x128xf32> to vector<8x128xbf16>
    %c0_74 = arith.constant 0 : index
    %c0_75 = arith.constant 0 : index
    %173 = vector.load %arg3[%c0_74, %c0_75] : memref<128x512xbf16, #tpu.memory_space<vmem>>, vector<128x512xbf16>
    %cst_76 = arith.constant dense<0.000000e+00> : vector<8x512xf32>
    %174 = tpu.matmul %172, %173, %cst_76 {dimension_numbers = #tpu.dot_dimension_numbers<[1], [0], [0], [1], [0, 0, 1, 1], [], []>} : vector<8x128xbf16>, vector<128x512xbf16>, vector<8x512xf32> -> vector<8x512xf32>
    %175 = arith.addf %171, %174 : vector<8x512xf32>
    %176 = vector.extract_strided_slice %175 {offsets = [0, 0], sizes = [8, 128], strides = [1, 1]} : vector<8x512xf32> to vector<8x128xf32>
    %cst_77 = arith.constant 5.000000e-01 : f32
    %177 = vector.broadcast %cst_77 : f32 to vector<8x128xf32>
    %178 = arith.mulf %177, %176 : vector<8x128xf32>
    %179 = math.tanh %178 : vector<8x128xf32>
    %cst_78 = arith.constant 5.000000e-01 : f32
    %180 = vector.broadcast %cst_78 : f32 to vector<8x128xf32>
    %181 = arith.mulf %180, %179 : vector<8x128xf32>
    %cst_79 = arith.constant 5.000000e-01 : f32
    %182 = vector.broadcast %cst_79 : f32 to vector<8x128xf32>
    %183 = arith.addf %181, %182 : vector<8x128xf32>
    %184 = vector.extract_strided_slice %175 {offsets = [0, 128], sizes = [8, 128], strides = [1, 1]} : vector<8x512xf32> to vector<8x128xf32>
    %cst_80 = arith.constant 5.000000e-01 : f32
    %185 = vector.broadcast %cst_80 : f32 to vector<8x128xf32>
    %186 = arith.mulf %185, %184 : vector<8x128xf32>
    %187 = math.tanh %186 : vector<8x128xf32>
    %cst_81 = arith.constant 5.000000e-01 : f32
    %188 = vector.broadcast %cst_81 : f32 to vector<8x128xf32>
    %189 = arith.mulf %188, %187 : vector<8x128xf32>
    %cst_82 = arith.constant 5.000000e-01 : f32
    %190 = vector.broadcast %cst_82 : f32 to vector<8x128xf32>
    %191 = arith.addf %189, %190 : vector<8x128xf32>
    %192 = vector.extract_strided_slice %175 {offsets = [0, 256], sizes = [8, 128], strides = [1, 1]} : vector<8x512xf32> to vector<8x128xf32>
    %193 = math.tanh %192 : vector<8x128xf32>
    %194 = vector.extract_strided_slice %175 {offsets = [0, 384], sizes = [8, 128], strides = [1, 1]} : vector<8x512xf32> to vector<8x128xf32>
    %cst_83 = arith.constant 5.000000e-01 : f32
    %195 = vector.broadcast %cst_83 : f32 to vector<8x128xf32>
    %196 = arith.mulf %195, %194 : vector<8x128xf32>
    %197 = math.tanh %196 : vector<8x128xf32>
    %cst_84 = arith.constant 5.000000e-01 : f32
    %198 = vector.broadcast %cst_84 : f32 to vector<8x128xf32>
    %199 = arith.mulf %198, %197 : vector<8x128xf32>
    %cst_85 = arith.constant 5.000000e-01 : f32
    %200 = vector.broadcast %cst_85 : f32 to vector<8x128xf32>
    %201 = arith.addf %199, %200 : vector<8x128xf32>
    %202 = arith.mulf %191, %163 : vector<8x128xf32>
    %203 = arith.mulf %183, %193 : vector<8x128xf32>
    %204 = arith.addf %202, %203 : vector<8x128xf32>
    %205 = math.tanh %204 : vector<8x128xf32>
    %206 = arith.mulf %201, %205 : vector<8x128xf32>
    %c0_86 = arith.constant 0 : index
    %c4_87 = arith.constant 4 : index
    %c0_88 = arith.constant 0 : index
    %207 = vector.load %arg6[%c0_86, %c4_87, %c0_88] : memref<8x8x128xf32, #tpu.memory_space<vmem>>, vector<8x1x128xf32>
    %208 = vector.shape_cast %207 : vector<8x1x128xf32> to vector<8x128xf32>
    %209 = vector.shape_cast %206 : vector<8x128xf32> to vector<8x1x128xf32>
    tpu.vector_store %arg6[%c0_86, %c4_87, %c0_88], %209 {strides = array<i32>} : memref<8x8x128xf32, #tpu.memory_space<vmem>>, vector<8x1x128xf32>,
    %c5 = arith.constant 5 : index
    %c0_89 = arith.constant 0 : index
    %c0_90 = arith.constant 0 : index
    %210 = vector.load %arg2[%c5, %c0_89, %c0_90] : memref<8x8x512xbf16, #tpu.memory_space<vmem>>, vector<1x8x512xbf16>
    %211 = vector.shape_cast %210 : vector<1x8x512xbf16> to vector<8x512xbf16>
    %212 = arith.extf %211 : vector<8x512xbf16> to vector<8x512xf32>
    %213 = arith.truncf %206 : vector<8x128xf32> to vector<8x128xbf16>
    %c0_91 = arith.constant 0 : index
    %c0_92 = arith.constant 0 : index
    %214 = vector.load %arg3[%c0_91, %c0_92] : memref<128x512xbf16, #tpu.memory_space<vmem>>, vector<128x512xbf16>
    %cst_93 = arith.constant dense<0.000000e+00> : vector<8x512xf32>
    %215 = tpu.matmul %213, %214, %cst_93 {dimension_numbers = #tpu.dot_dimension_numbers<[1], [0], [0], [1], [0, 0, 1, 1], [], []>} : vector<8x128xbf16>, vector<128x512xbf16>, vector<8x512xf32> -> vector<8x512xf32>
    %216 = arith.addf %212, %215 : vector<8x512xf32>
    %217 = vector.extract_strided_slice %216 {offsets = [0, 0], sizes = [8, 128], strides = [1, 1]} : vector<8x512xf32> to vector<8x128xf32>
    %cst_94 = arith.constant 5.000000e-01 : f32
    %218 = vector.broadcast %cst_94 : f32 to vector<8x128xf32>
    %219 = arith.mulf %218, %217 : vector<8x128xf32>
    %220 = math.tanh %219 : vector<8x128xf32>
    %cst_95 = arith.constant 5.000000e-01 : f32
    %221 = vector.broadcast %cst_95 : f32 to vector<8x128xf32>
    %222 = arith.mulf %221, %220 : vector<8x128xf32>
    %cst_96 = arith.constant 5.000000e-01 : f32
    %223 = vector.broadcast %cst_96 : f32 to vector<8x128xf32>
    %224 = arith.addf %222, %223 : vector<8x128xf32>
    %225 = vector.extract_strided_slice %216 {offsets = [0, 128], sizes = [8, 128], strides = [1, 1]} : vector<8x512xf32> to vector<8x128xf32>
    %cst_97 = arith.constant 5.000000e-01 : f32
    %226 = vector.broadcast %cst_97 : f32 to vector<8x128xf32>
    %227 = arith.mulf %226, %225 : vector<8x128xf32>
    %228 = math.tanh %227 : vector<8x128xf32>
    %cst_98 = arith.constant 5.000000e-01 : f32
    %229 = vector.broadcast %cst_98 : f32 to vector<8x128xf32>
    %230 = arith.mulf %229, %228 : vector<8x128xf32>
    %cst_99 = arith.constant 5.000000e-01 : f32
    %231 = vector.broadcast %cst_99 : f32 to vector<8x128xf32>
    %232 = arith.addf %230, %231 : vector<8x128xf32>
    %233 = vector.extract_strided_slice %216 {offsets = [0, 256], sizes = [8, 128], strides = [1, 1]} : vector<8x512xf32> to vector<8x128xf32>
    %234 = math.tanh %233 : vector<8x128xf32>
    %235 = vector.extract_strided_slice %216 {offsets = [0, 384], sizes = [8, 128], strides = [1, 1]} : vector<8x512xf32> to vector<8x128xf32>
    %cst_100 = arith.constant 5.000000e-01 : f32
    %236 = vector.broadcast %cst_100 : f32 to vector<8x128xf32>
    %237 = arith.mulf %236, %235 : vector<8x128xf32>
    %238 = math.tanh %237 : vector<8x128xf32>
    %cst_101 = arith.constant 5.000000e-01 : f32
    %239 = vector.broadcast %cst_101 : f32 to vector<8x128xf32>
    %240 = arith.mulf %239, %238 : vector<8x128xf32>
    %cst_102 = arith.constant 5.000000e-01 : f32
    %241 = vector.broadcast %cst_102 : f32 to vector<8x128xf32>
    %242 = arith.addf %240, %241 : vector<8x128xf32>
    %243 = arith.mulf %232, %204 : vector<8x128xf32>
    %244 = arith.mulf %224, %234 : vector<8x128xf32>
    %245 = arith.addf %243, %244 : vector<8x128xf32>
    %246 = math.tanh %245 : vector<8x128xf32>
    %247 = arith.mulf %242, %246 : vector<8x128xf32>
    %c0_103 = arith.constant 0 : index
    %c5_104 = arith.constant 5 : index
    %c0_105 = arith.constant 0 : index
    %248 = vector.load %arg6[%c0_103, %c5_104, %c0_105] : memref<8x8x128xf32, #tpu.memory_space<vmem>>, vector<8x1x128xf32>
    %249 = vector.shape_cast %248 : vector<8x1x128xf32> to vector<8x128xf32>
    %250 = vector.shape_cast %247 : vector<8x128xf32> to vector<8x1x128xf32>
    tpu.vector_store %arg6[%c0_103, %c5_104, %c0_105], %250 {strides = array<i32>} : memref<8x8x128xf32, #tpu.memory_space<vmem>>, vector<8x1x128xf32>,
    %c6 = arith.constant 6 : index
    %c0_106 = arith.constant 0 : index
    %c0_107 = arith.constant 0 : index
    %251 = vector.load %arg2[%c6, %c0_106, %c0_107] : memref<8x8x512xbf16, #tpu.memory_space<vmem>>, vector<1x8x512xbf16>
    %252 = vector.shape_cast %251 : vector<1x8x512xbf16> to vector<8x512xbf16>
    %253 = arith.extf %252 : vector<8x512xbf16> to vector<8x512xf32>
    %254 = arith.truncf %247 : vector<8x128xf32> to vector<8x128xbf16>
    %c0_108 = arith.constant 0 : index
    %c0_109 = arith.constant 0 : index
    %255 = vector.load %arg3[%c0_108, %c0_109] : memref<128x512xbf16, #tpu.memory_space<vmem>>, vector<128x512xbf16>
    %cst_110 = arith.constant dense<0.000000e+00> : vector<8x512xf32>
    %256 = tpu.matmul %254, %255, %cst_110 {dimension_numbers = #tpu.dot_dimension_numbers<[1], [0], [0], [1], [0, 0, 1, 1], [], []>} : vector<8x128xbf16>, vector<128x512xbf16>, vector<8x512xf32> -> vector<8x512xf32>
    %257 = arith.addf %253, %256 : vector<8x512xf32>
    %258 = vector.extract_strided_slice %257 {offsets = [0, 0], sizes = [8, 128], strides = [1, 1]} : vector<8x512xf32> to vector<8x128xf32>
    %cst_111 = arith.constant 5.000000e-01 : f32
    %259 = vector.broadcast %cst_111 : f32 to vector<8x128xf32>
    %260 = arith.mulf %259, %258 : vector<8x128xf32>
    %261 = math.tanh %260 : vector<8x128xf32>
    %cst_112 = arith.constant 5.000000e-01 : f32
    %262 = vector.broadcast %cst_112 : f32 to vector<8x128xf32>
    %263 = arith.mulf %262, %261 : vector<8x128xf32>
    %cst_113 = arith.constant 5.000000e-01 : f32
    %264 = vector.broadcast %cst_113 : f32 to vector<8x128xf32>
    %265 = arith.addf %263, %264 : vector<8x128xf32>
    %266 = vector.extract_strided_slice %257 {offsets = [0, 128], sizes = [8, 128], strides = [1, 1]} : vector<8x512xf32> to vector<8x128xf32>
    %cst_114 = arith.constant 5.000000e-01 : f32
    %267 = vector.broadcast %cst_114 : f32 to vector<8x128xf32>
    %268 = arith.mulf %267, %266 : vector<8x128xf32>
    %269 = math.tanh %268 : vector<8x128xf32>
    %cst_115 = arith.constant 5.000000e-01 : f32
    %270 = vector.broadcast %cst_115 : f32 to vector<8x128xf32>
    %271 = arith.mulf %270, %269 : vector<8x128xf32>
    %cst_116 = arith.constant 5.000000e-01 : f32
    %272 = vector.broadcast %cst_116 : f32 to vector<8x128xf32>
    %273 = arith.addf %271, %272 : vector<8x128xf32>
    %274 = vector.extract_strided_slice %257 {offsets = [0, 256], sizes = [8, 128], strides = [1, 1]} : vector<8x512xf32> to vector<8x128xf32>
    %275 = math.tanh %274 : vector<8x128xf32>
    %276 = vector.extract_strided_slice %257 {offsets = [0, 384], sizes = [8, 128], strides = [1, 1]} : vector<8x512xf32> to vector<8x128xf32>
    %cst_117 = arith.constant 5.000000e-01 : f32
    %277 = vector.broadcast %cst_117 : f32 to vector<8x128xf32>
    %278 = arith.mulf %277, %276 : vector<8x128xf32>
    %279 = math.tanh %278 : vector<8x128xf32>
    %cst_118 = arith.constant 5.000000e-01 : f32
    %280 = vector.broadcast %cst_118 : f32 to vector<8x128xf32>
    %281 = arith.mulf %280, %279 : vector<8x128xf32>
    %cst_119 = arith.constant 5.000000e-01 : f32
    %282 = vector.broadcast %cst_119 : f32 to vector<8x128xf32>
    %283 = arith.addf %281, %282 : vector<8x128xf32>
    %284 = arith.mulf %273, %245 : vector<8x128xf32>
    %285 = arith.mulf %265, %275 : vector<8x128xf32>
    %286 = arith.addf %284, %285 : vector<8x128xf32>
    %287 = math.tanh %286 : vector<8x128xf32>
    %288 = arith.mulf %283, %287 : vector<8x128xf32>
    %c0_120 = arith.constant 0 : index
    %c6_121 = arith.constant 6 : index
    %c0_122 = arith.constant 0 : index
    %289 = vector.load %arg6[%c0_120, %c6_121, %c0_122] : memref<8x8x128xf32, #tpu.memory_space<vmem>>, vector<8x1x128xf32>
    %290 = vector.shape_cast %289 : vector<8x1x128xf32> to vector<8x128xf32>
    %291 = vector.shape_cast %288 : vector<8x128xf32> to vector<8x1x128xf32>
    tpu.vector_store %arg6[%c0_120, %c6_121, %c0_122], %291 {strides = array<i32>} : memref<8x8x128xf32, #tpu.memory_space<vmem>>, vector<8x1x128xf32>,
    %c7 = arith.constant 7 : index
    %c0_123 = arith.constant 0 : index
    %c0_124 = arith.constant 0 : index
    %292 = vector.load %arg2[%c7, %c0_123, %c0_124] : memref<8x8x512xbf16, #tpu.memory_space<vmem>>, vector<1x8x512xbf16>
    %293 = vector.shape_cast %292 : vector<1x8x512xbf16> to vector<8x512xbf16>
    %294 = arith.extf %293 : vector<8x512xbf16> to vector<8x512xf32>
    %295 = arith.truncf %288 : vector<8x128xf32> to vector<8x128xbf16>
    %c0_125 = arith.constant 0 : index
    %c0_126 = arith.constant 0 : index
    %296 = vector.load %arg3[%c0_125, %c0_126] : memref<128x512xbf16, #tpu.memory_space<vmem>>, vector<128x512xbf16>
    %cst_127 = arith.constant dense<0.000000e+00> : vector<8x512xf32>
    %297 = tpu.matmul %295, %296, %cst_127 {dimension_numbers = #tpu.dot_dimension_numbers<[1], [0], [0], [1], [0, 0, 1, 1], [], []>} : vector<8x128xbf16>, vector<128x512xbf16>, vector<8x512xf32> -> vector<8x512xf32>
    %298 = arith.addf %294, %297 : vector<8x512xf32>
    %299 = vector.extract_strided_slice %298 {offsets = [0, 0], sizes = [8, 128], strides = [1, 1]} : vector<8x512xf32> to vector<8x128xf32>
    %cst_128 = arith.constant 5.000000e-01 : f32
    %300 = vector.broadcast %cst_128 : f32 to vector<8x128xf32>
    %301 = arith.mulf %300, %299 : vector<8x128xf32>
    %302 = math.tanh %301 : vector<8x128xf32>
    %cst_129 = arith.constant 5.000000e-01 : f32
    %303 = vector.broadcast %cst_129 : f32 to vector<8x128xf32>
    %304 = arith.mulf %303, %302 : vector<8x128xf32>
    %cst_130 = arith.constant 5.000000e-01 : f32
    %305 = vector.broadcast %cst_130 : f32 to vector<8x128xf32>
    %306 = arith.addf %304, %305 : vector<8x128xf32>
    %307 = vector.extract_strided_slice %298 {offsets = [0, 128], sizes = [8, 128], strides = [1, 1]} : vector<8x512xf32> to vector<8x128xf32>
    %cst_131 = arith.constant 5.000000e-01 : f32
    %308 = vector.broadcast %cst_131 : f32 to vector<8x128xf32>
    %309 = arith.mulf %308, %307 : vector<8x128xf32>
    %310 = math.tanh %309 : vector<8x128xf32>
    %cst_132 = arith.constant 5.000000e-01 : f32
    %311 = vector.broadcast %cst_132 : f32 to vector<8x128xf32>
    %312 = arith.mulf %311, %310 : vector<8x128xf32>
    %cst_133 = arith.constant 5.000000e-01 : f32
    %313 = vector.broadcast %cst_133 : f32 to vector<8x128xf32>
    %314 = arith.addf %312, %313 : vector<8x128xf32>
    %315 = vector.extract_strided_slice %298 {offsets = [0, 256], sizes = [8, 128], strides = [1, 1]} : vector<8x512xf32> to vector<8x128xf32>
    %316 = math.tanh %315 : vector<8x128xf32>
    %317 = vector.extract_strided_slice %298 {offsets = [0, 384], sizes = [8, 128], strides = [1, 1]} : vector<8x512xf32> to vector<8x128xf32>
    %cst_134 = arith.constant 5.000000e-01 : f32
    %318 = vector.broadcast %cst_134 : f32 to vector<8x128xf32>
    %319 = arith.mulf %318, %317 : vector<8x128xf32>
    %320 = math.tanh %319 : vector<8x128xf32>
    %cst_135 = arith.constant 5.000000e-01 : f32
    %321 = vector.broadcast %cst_135 : f32 to vector<8x128xf32>
    %322 = arith.mulf %321, %320 : vector<8x128xf32>
    %cst_136 = arith.constant 5.000000e-01 : f32
    %323 = vector.broadcast %cst_136 : f32 to vector<8x128xf32>
    %324 = arith.addf %322, %323 : vector<8x128xf32>
    %325 = arith.mulf %314, %286 : vector<8x128xf32>
    %326 = arith.mulf %306, %316 : vector<8x128xf32>
    %327 = arith.addf %325, %326 : vector<8x128xf32>
    %328 = math.tanh %327 : vector<8x128xf32>
    %329 = arith.mulf %324, %328 : vector<8x128xf32>
    %c0_137 = arith.constant 0 : index
    %c7_138 = arith.constant 7 : index
    %c0_139 = arith.constant 0 : index
    %330 = vector.load %arg6[%c0_137, %c7_138, %c0_139] : memref<8x8x128xf32, #tpu.memory_space<vmem>>, vector<8x1x128xf32>
    %331 = vector.shape_cast %330 : vector<8x1x128xf32> to vector<8x128xf32>
    %332 = vector.shape_cast %329 : vector<8x128xf32> to vector<8x1x128xf32>
    tpu.vector_store %arg6[%c0_137, %c7_138, %c0_139], %332 {strides = array<i32>} : memref<8x8x128xf32, #tpu.memory_space<vmem>>, vector<8x1x128xf32>,
    %c0_140 = arith.constant 0 : index
    %c0_141 = arith.constant 0 : index
    %333 = vector.load %arg7[%c0_140, %c0_141] : memref<8x128xf32, #tpu.memory_space<vmem>>, vector<8x128xf32>
    tpu.vector_store %arg7[%c0_140, %c0_141], %329 {strides = array<i32>} : memref<8x128xf32, #tpu.memory_space<vmem>>, vector<8x128xf32>,
    %c0_142 = arith.constant 0 : index
    %c0_143 = arith.constant 0 : index
    %334 = vector.load %arg8[%c0_142, %c0_143] : memref<8x128xf32, #tpu.memory_space<vmem>>, vector<8x128xf32>
    tpu.vector_store %arg8[%c0_142, %c0_143], %327 {strides = array<i32>} : memref<8x128xf32, #tpu.memory_space<vmem>>, vector<8x128xf32>,
    return
  }
  func.func @transform_0(%arg0: i32, %arg1: i32) -> (i32, i32, i32) {
    %c0_i32 = arith.constant 0 : i32
    %c0_i32_0 = arith.constant 0 : i32
    return %arg1, %arg0, %c0_i32 : i32, i32, i32
  }
  func.func @transform_1(%arg0: i32, %arg1: i32) -> (i32, i32) {
    %c0_i32 = arith.constant 0 : i32
    %c0_i32_0 = arith.constant 0 : i32
    %c0_i32_1 = arith.constant 0 : i32
    return %c0_i32, %c0_i32_0 : i32, i32
  }
  func.func @transform_2(%arg0: i32, %arg1: i32) -> (i32, i32) {
    %c0_i32 = arith.constant 0 : i32
    %c0_i32_0 = arith.constant 0 : i32
    return %arg0, %c0_i32 : i32, i32
  }
  func.func @transform_3(%arg0: i32, %arg1: i32) -> (i32, i32) {
    %c0_i32 = arith.constant 0 : i32
    %c0_i32_0 = arith.constant 0 : i32
    return %arg0, %c0_i32 : i32, i32
  }
  func.func @transform_4(%arg0: i32, %arg1: i32) -> (i32, i32, i32) {
    %c0_i32 = arith.constant 0 : i32
    %c0_i32_0 = arith.constant 0 : i32
    return %arg0, %arg1, %c0_i32 : i32, i32, i32
  }
}

</mosaic_0001>

<bundles_post_ra>
// kernel: rnn_decoder_forward.1
= control target key start
LH: loop header
LB: loop body
LE: loop exit
PB: predicated region body
PF: predicated region fallthrough
CT: control target
= control target key end

     0   :  { %v3473_v1 = vmov 0   ;;  %s4416_s1 = inlined_call_operand.vmem [shape: bf16[128,512], index: 1, kind: input, shape index: {}]   ;;  %s4417_s2 = inlined_call_operand.vmem [shape: f32[8,128], index: 2, kind: input, shape index: {}, may-alias: {2,3}]   ;;  %s4418_s0 = inlined_call_operand.vmem [shape: bf16[8,8,512], index: 0, kind: input, shape index: {}]   ;;  %s4419_s3 = inlined_call_operand.vmem [shape: f32[8,128], index: 3, kind: input, shape index: {}, may-alias: {2,3}]   ;;  %s4420_s4 = inlined_call_operand.vmem [shape: f32[8,8,128], index: 4, kind: output, shape index: {}]  }
   0x1   :  { %v3503_v0 = vld [vmem:[%s4416_s1 + $0xe4] ss:$16 sps:$4 sm:$0xff]   ;;  %259 = vmatprep.mubr.bf16.mxu0 %v3473_v1  ;;  %300 = vmatprep.mubr.bf16.mxu1 %v3473_v1  ;;  %v3510_v2 = vld [vmem:[%s4416_s1 + $0xe0] ss:$16 sps:$4 sm:$0xff]   ;;  %v3516_v3 = vld [vmem:[%s4416_s1 + $0xec] ss:$16 sps:$4 sm:$0xff]  }
   0x2   :  { %227 = vmatprep.subr.bf16.mxu0 %v3503_v0  ;;  %v3521_v4 = vld [vmem:[%s4416_s1 + $0xe8] ss:$16 sps:$4 sm:$0xff]   ;;  %v3527_v5 = vld [vmem:[%s4416_s1 + $0xc4] ss:$16 sps:$4 sm:$0xff]   ;;  %v3532_v6 = vld [vmem:[%s4416_s1 + $0xc0] ss:$16 sps:$4 sm:$0xff]   ;;  %268 = vmatprep.subr.bf16.mxu1 %v3516_v3 }
   0x3   :  { %228 = vmatpush1.bf16.msra.mxu0 %v3510_v2  ;;  %v3538_v7 = vld [vmem:[%s4416_s1 + $0xcc] ss:$16 sps:$4 sm:$0xff]   ;;  %269 = vmatpush1.bf16.msra.mxu1 %v3521_v4  ;;  %v3545_v8 = vld [vmem:[%s4416_s1 + $0xc8] ss:$16 sps:$4 sm:$0xff]   ;;  %v3551_v9 = vld [vmem:[%s4416_s1 + $0xa4] ss:$16 sps:$4 sm:$0xff]  }
   0x4   :  { %229 = vmatprep.subr.bf16.mxu0 %v3527_v5  ;;  %270 = vmatprep.subr.bf16.mxu1 %v3538_v7  ;;  %v3557_v10 = vld [vmem:[%s4416_s1 + $0xa0] ss:$16 sps:$4 sm:$0xff]   ;;  %v3562_v11 = vld [vmem:[%s4416_s1 + $0xac] ss:$16 sps:$4 sm:$0xff]   ;;  %v3568_v12 = vld [vmem:[%s4416_s1 + $0x84] ss:$16 sps:$4 sm:$0xff]  }
   0x5   :  { %v3574_v13 = vld [vmem:[%s4416_s1 + $0xa8] ss:$16 sps:$4 sm:$0xff]   ;;  %v3580_v14 = vld [vmem:[%s4416_s1 + $0x8c] ss:$16 sps:$4 sm:$0xff]   ;;  %v3586_v15 = vld [vmem:[%s4416_s1 + $0x80] ss:$16 sps:$4 sm:$0xff]  }
   0x6   :  { %v3592_v16 = vld [vmem:[%s4416_s1 + $0x64] ss:$16 sps:$4 sm:$0xff]   ;;  %v3598_v17 = vld [vmem:[%s4416_s1 + $0x88] ss:$16 sps:$4 sm:$0xff]   ;;  %v3604_v18 = vld [vmem:[%s4416_s1 + $0x6c] ss:$16 sps:$4 sm:$0xff]  }
   0x7   :  { %230 = vmatpush1.bf16.msra.mxu0 %v3532_v6  ;;  %271 = vmatpush1.bf16.msra.mxu1 %v3545_v8  ;;  %v3610_v19 = vld [vmem:[%s4416_s1 + $0x60] ss:$16 sps:$4 sm:$0xff]   ;;  %v3616_v20 = vld [vmem:[%s4416_s1 + $0x44] ss:$16 sps:$4 sm:$0xff]   ;;  %v3622_v21 = vld [vmem:[%s4416_s1 + $0x68] ss:$16 sps:$4 sm:$0xff]  }
   0x8   :  { %231 = vmatprep.subr.bf16.mxu0 %v3551_v9  ;;  %272 = vmatprep.subr.bf16.mxu1 %v3562_v11  ;;  %v3628_v22 = vld [vmem:[%s4416_s1 + $0x4c] ss:$16 sps:$4 sm:$0xff]   ;;  %v3634_v23 = vld [vmem:[%s4416_s1 + $0x40] ss:$16 sps:$4 sm:$0xff]   ;;  %v3640_v24 = vld [vmem:[%s4416_s1 + $0x24] ss:$16 sps:$4 sm:$0xff]  }
   0x9   :  { %v3646_v25 = vld [vmem:[%s4416_s1 + $0x48] ss:$16 sps:$4 sm:$0xff]   ;;  %v3651_v26 = vld [vmem:[%s4416_s1 + $0x20] ss:$16 sps:$4 sm:$0xff]   ;;  %v3656_v27 = vld [vmem:[%s4416_s1 + $0x2c] ss:$16 sps:$4 sm:$0xff]  }
   0xa   :  { %v3662_v28 = vld [vmem:[%s4416_s1 + $0x4] ss:$16 sps:$4 sm:$0xff]   ;;  %v3668_v29 = vld [vmem:[%s4416_s1 + $0x28] ss:$16 sps:$4 sm:$0xff]   ;;  %v3674_v30 = vld [vmem:[%s4416_s1 + $0xc] ss:$16 sps:$4 sm:$0xff]  }
   0xb   :  { %232 = vmatpush1.bf16.msra.mxu0 %v3557_v10  ;;  %273 = vmatpush1.bf16.msra.mxu1 %v3574_v13  ;;  %v3680_v31 = vld [vmem:[%s4416_s1] ss:$16 sps:$4 sm:$0xff]   ;;  %v3690_v33 = vld [vmem:[%s4416_s1 + $0x8] ss:$16 sps:$4 sm:$0xff]  }
   0xc   :  { %233 = vmatprep.subr.bf16.mxu0 %v3568_v12  ;;  %274 = vmatprep.subr.bf16.mxu1 %v3580_v14  ;;  %v22_v32 = vld [vmem:[%s4417_s2] sm:$0xff]  ;;  %v29_v37 = vld [vmem:[%s4418_s0 + $0x8] sm:$0xff] }
   0xd   :  { %v34_v34 = vpack.c.bf16 %v22_v32, %v22_v32  ;;  %v28_v35 = vld [vmem:[%s4418_s0] sm:$0xff]  ;;  %v32_v41 = vunpack.c.l.bf16 %v29_v37  ;;  %v33_v53 = vunpack.c.h.bf16 %v29_v37 }
   0xe   :  { %v30_v36 = vunpack.c.l.bf16 %v28_v35  ;;  %v31_v38 = vunpack.c.h.bf16 %v28_v35  ;;  %v24_v62 = vld [vmem:[%s4419_s3] sm:$0xff] }
   0xf   :  { %234 = vmatpush1.bf16.msra.mxu0 %v3586_v15  ;;  %275 = vmatpush1.bf16.msra.mxu1 %v3598_v17 }
  0x10   :  { %235 = vmatprep.subr.bf16.mxu0 %v3592_v16  ;;  %276 = vmatprep.subr.bf16.mxu1 %v3604_v18 }
  0x13   :  { %236 = vmatpush1.bf16.msra.mxu0 %v3610_v19  ;;  %277 = vmatpush1.bf16.msra.mxu1 %v3622_v21 }
  0x14   :  { %237 = vmatprep.subr.bf16.mxu0 %v3616_v20  ;;  %278 = vmatprep.subr.bf16.mxu1 %v3628_v22 }
  0x17   :  { %238 = vmatpush1.bf16.msra.mxu0 %v3634_v23  ;;  %279 = vmatpush1.bf16.msra.mxu1 %v3646_v25 }
  0x18   :  { %239 = vmatprep.subr.bf16.mxu0 %v3640_v24  ;;  %280 = vmatprep.subr.bf16.mxu1 %v3656_v27 }
  0x1b   :  { %240 = vmatpush1.bf16.msra.mxu0 %v3651_v26  ;;  %281 = vmatpush1.bf16.msra.mxu1 %v3668_v29 }
  0x1c   :  { %241 = vmatprep.subr.bf16.mxu0 %v3662_v28  ;;  %282 = vmatprep.subr.bf16.mxu1 %v3674_v30 }
  0x1f   :  { %242 = vmatpush1.bf16.msra.mxu0 %v3680_v31  ;;  %283 = vmatpush1.bf16.msra.mxu1 %v3690_v33 }
  0x20   :  { %597 = vmatprep.subr.bf16.mxu0 %v3503_v0  ;;  %638 = vmatprep.subr.bf16.mxu1 %v3516_v3 }
  0x22   :  { %260 = vmatmul.mubr.bf16.vlgmr.msra.gmra.mxu0 %v34_v34  ;;  %301 = vmatmul.mubr.bf16.vlgmr.msra.gmra.mxu1 %v34_v34 }
  0x23   :  { %598 = vmatpush1.bf16.msra.mxu0 %v3510_v2  ;;  %629 = vmatprep.mubr.bf16.mxu0 %v3473_v1 }
  0x24   :  { %599 = vmatprep.subr.bf16.mxu0 %v3527_v5  ;;  %639 = vmatpush1.bf16.msra.mxu1 %v3521_v4 }
  0x25   :  { %670 = vmatprep.mubr.bf16.mxu1 %v3473_v1  ;;  %640 = vmatprep.subr.bf16.mxu1 %v3538_v7 }
  0x27   :  { %600 = vmatpush1.bf16.msra.mxu0 %v3532_v6 }
  0x28   :  { %601 = vmatprep.subr.bf16.mxu0 %v3551_v9  ;;  %641 = vmatpush1.bf16.msra.mxu1 %v3545_v8 }
  0x29   :  { %642 = vmatprep.subr.bf16.mxu1 %v3562_v11 }
  0x2b   :  { %602 = vmatpush1.bf16.msra.mxu0 %v3557_v10 }
  0x2c   :  { %603 = vmatprep.subr.bf16.mxu0 %v3568_v12  ;;  %643 = vmatpush1.bf16.msra.mxu1 %v3574_v13 }
  0x2d   :  { %644 = vmatprep.subr.bf16.mxu1 %v3580_v14 }
  0x2f   :  { %604 = vmatpush1.bf16.msra.mxu0 %v3586_v15 }
  0x30   :  { %605 = vmatprep.subr.bf16.mxu0 %v3592_v16  ;;  %645 = vmatpush1.bf16.msra.mxu1 %v3598_v17 }
  0x31   :  { %646 = vmatprep.subr.bf16.mxu1 %v3604_v18 }
  0x33   :  { %606 = vmatpush1.bf16.msra.mxu0 %v3610_v19 }
  0x34   :  { %607 = vmatprep.subr.bf16.mxu0 %v3616_v20  ;;  %647 = vmatpush1.bf16.msra.mxu1 %v3622_v21 }
  0x35   :  { %648 = vmatprep.subr.bf16.mxu1 %v3628_v22 }
  0x37   :  { %608 = vmatpush1.bf16.msra.mxu0 %v3634_v23 }
  0x38   :  { %609 = vmatprep.subr.bf16.mxu0 %v3640_v24  ;;  %649 = vmatpush1.bf16.msra.mxu1 %v3646_v25 }
  0x39   :  { %650 = vmatprep.subr.bf16.mxu1 %v3656_v27 }
  0x3b   :  { %610 = vmatpush1.bf16.msra.mxu0 %v3651_v26 }
  0x3c   :  { %611 = vmatprep.subr.bf16.mxu0 %v3662_v28  ;;  %651 = vmatpush1.bf16.msra.mxu1 %v3668_v29 }
  0x3d   :  { %652 = vmatprep.subr.bf16.mxu1 %v3674_v30 }
  0x3f   :  { %612 = vmatpush1.bf16.msra.mxu0 %v3680_v31 }
  0x40   :  { %967 = vmatprep.subr.bf16.mxu0 %v3503_v0  ;;  %653 = vmatpush1.bf16.msra.mxu1 %v3690_v33 }
  0x41   :  { %1008 = vmatprep.subr.bf16.mxu1 %v3516_v3 }
  0xe2   :  { %v261_v39 = vpop.f32.mrf.mxu0  ;;  %v302_v43 = vpop.f32.mrf.mxu1 }
  0xe3   :  { %v309_v40 = vadd.f32 %v261_v39, %v30_v36  ;;  %v311_v49 = vadd.f32 %v302_v43, %v32_v41  ;;  %v3474_v36 = vmov 1966171168  }
  0xe4   :  { %v263_v42 = vpop.f32.mrf.mxu0  ;;  %v304_v47 = vpop.f32.mrf.mxu1  ;;  %v334_v37 = vunpack.c.l.s4 %v3474_v36 }
  0xe5   :  { %v313_v44 = vmul.f32 0.5, %v309_v40  ;;  %v310_v45 = vadd.f32 %v263_v42, %v31_v38  ;;  %v312_v54 = vadd.f32 %v304_v47, %v33_v53  ;;  %v336_v38 = vlaneseq }
  0xe6   :  { %v265_v46 = vpop.f32.mrf.mxu0  ;;  %v306_v51 = vpop.f32.mrf.mxu1  ;;  %v335_v41 = vunpack.c.0.s8 %v334_v37 }
  0xe7   :  { %3393 = vtanh.f32 %v313_v44  ;;  %v317_v48 = vmul.f32 0.5, %v310_v45  ;;  %v322_v55 = vmul.f32 0.5, %v312_v54  ;;  %v337_v42 = vshrl.u32 %v336_v38, 7 }
  0xe8   :  { %v266_v50 = vpop.f32.mrf.mxu0  ;;  %v307_v52 = vpop.f32.mrf.mxu1 }
  0xe9   :  { %3395 = vtanh.f32 %v317_v48  ;;  %v3745_v44 = vsub.s32 %v335_v41, %v337_v42 }
  0xea   :  { %3397 = vtanh.f32 %v311_v49 }
  0xeb   :  { %3399 = vtanh.f32 %v322_v55 }
  0xf4   :  { %v3394_v56 = vpop.eup %3393 }
  0xf5   :  { %v315_v57 = vmul.f32 0.5, %v3394_v56 }
  0xf6   :  { %v3396_v58 = vpop.eup %3395 }
  0xf7   :  { %v316_v59 = vadd.f32 0.5, %v315_v57  ;;  %v319_v60 = vmul.f32 0.5, %v3396_v58  ;;  %v3398_v61 = vpop.eup %3397 }
  0xf8   :  { %v3400_v39 = vpop.eup %3399 }
  0xf9   :  { %v320_v63 = vadd.f32 0.5, %v319_v60  ;;  %v327_v34 = vmul.f32 %v3398_v61, %v316_v59  ;;  %v324_v40 = vmul.f32 0.5, %v3400_v39  ;;  %v3029_v61 = vld [vmem:[%s4418_s0 + $0x10] sm:$0xff] }
  0xfb   :  { %v326_v32 = vmul.f32 %v320_v63, %v24_v62  ;;  %v325_v43 = vadd.f32 0.5, %v324_v40  ;;  %v400_v62 = vunpack.c.l.bf16 %v3029_v61  ;;  %v401_v63 = vunpack.c.h.bf16 %v3029_v61 }
  0xfd   :  { %v3742_v35 = vadd.f32 %v327_v34, %v326_v32  ;;  %v3030_v34 = vld [vmem:[%s4418_s0 + $0x18] sm:$0xff] }
  0xfe   :  { %v402_v41 = vunpack.c.l.bf16 %v3030_v34 }
  0xff   :  { %3401 = vtanh.f32 %v3742_v35 }
 0x10c   :  { %v3402_v45 = vpop.eup %3401 }
 0x10d   :  { %v330_v46 = vmul.f32 %v3402_v45, %v325_v43 }
 0x10f   :  { %v332_v47 = vcombine.high %v330_v46, %v330_v46  ;;  %v339_v48 = vrot.slane %v330_v46, %v3745_v44  ;;  %v404_v49 = vpack.c.bf16 %v330_v46, %v330_v46 }
 0x111   :  { %v346_v50 = vrot.slane %v332_v47, %v3745_v44  ;;  %v347_v51 = vcombine.high %v339_v48, %v339_v48  ;;  %v355_v52 = vrot.slane %v339_v48, %v3745_v44  ;;  %3025 = vst.sshfl [vmem:[%s4420_s4] sm:$0x1 pattern:$0x73625140] %v339_v48  ;;  %630 = vmatmul.mubr.bf16.vlgmr.msra.gmra.mxu0 %v404_v49  ;;  %v403_v48 = vunpack.c.h.bf16 %v3030_v34 }
 0x112   :  { %671 = vmatmul.mubr.bf16.vlgmr.msra.gmra.mxu1 %v404_v49  ;;  %968 = vmatpush1.bf16.msra.mxu0 %v3510_v2 }
 0x113   :  { %1009 = vmatpush1.bf16.msra.mxu1 %v3521_v4  ;;  %v348_v53 = vcombine.high %v346_v50, %v346_v50  ;;  %v362_v54 = vrot.slane %v346_v50, %v3745_v44  ;;  %v369_v55 = vrot.slane %v347_v51, %v3745_v44  ;;  %v377_v56 = vcombine.high %v355_v52, %v355_v52 }
 0x114   :  { %3026 = vst.sshfl [vmem:[%s4420_s4 + $0x8] sm:$0x1 pattern:$0x73625140] %v347_v51  ;;  %969 = vmatprep.subr.bf16.mxu0 %v3527_v5  ;;  %1010 = vmatprep.subr.bf16.mxu1 %v3538_v7 }
 0x115   :  { %3027 = vst.sshfl [vmem:[%s4420_s4 + $0x20] sm:$0x1 pattern:$0x73625140] %v346_v50  ;;  %999 = vmatprep.mubr.bf16.mxu0 %v3473_v1  ;;  %v376_v57 = vrot.slane %v348_v53, %v3745_v44  ;;  %v378_v58 = vcombine.high %v362_v54, %v362_v54  ;;  %v379_v59 = vcombine.high %v369_v55, %v369_v55  ;;  %391 = vst [vmem:[%s4420_s4 + $0x10] sm:$0x1] %v377_v56 }
 0x116   :  { %3028 = vst.sshfl [vmem:[%s4420_s4 + $0x28] sm:$0x1 pattern:$0x73625140] %v348_v53  ;;  %1040 = vmatprep.mubr.bf16.mxu1 %v3473_v1  ;;  %970 = vmatpush1.bf16.msra.mxu0 %v3532_v6 }
 0x117   :  { %1011 = vmatpush1.bf16.msra.mxu1 %v3545_v8  ;;  %v380_v60 = vcombine.high %v376_v57, %v376_v57  ;;  %392 = vst [vmem:[%s4420_s4 + $0x18] sm:$0x1] %v379_v59  ;;  %395 = vst [vmem:[%s4420_s4 + $0x30] sm:$0x1] %v378_v58  ;;  %971 = vmatprep.subr.bf16.mxu0 %v3551_v9 }
 0x118   :  { %1012 = vmatprep.subr.bf16.mxu1 %v3562_v11 }
 0x119   :  { %396 = vst [vmem:[%s4420_s4 + $0x38] sm:$0x1] %v380_v60 }
 0x11a   :  { %972 = vmatpush1.bf16.msra.mxu0 %v3557_v10 }
 0x11b   :  { %1013 = vmatpush1.bf16.msra.mxu1 %v3574_v13  ;;  %973 = vmatprep.subr.bf16.mxu0 %v3568_v12 }
 0x11c   :  { %1014 = vmatprep.subr.bf16.mxu1 %v3580_v14 }
 0x11e   :  { %974 = vmatpush1.bf16.msra.mxu0 %v3586_v15 }
 0x11f   :  { %1015 = vmatpush1.bf16.msra.mxu1 %v3598_v17  ;;  %975 = vmatprep.subr.bf16.mxu0 %v3592_v16 }
 0x120   :  { %1016 = vmatprep.subr.bf16.mxu1 %v3604_v18 }
 0x122   :  { %976 = vmatpush1.bf16.msra.mxu0 %v3610_v19 }
 0x123   :  { %1017 = vmatpush1.bf16.msra.mxu1 %v3622_v21  ;;  %977 = vmatprep.subr.bf16.mxu0 %v3616_v20 }
 0x124   :  { %1018 = vmatprep.subr.bf16.mxu1 %v3628_v22 }
 0x126   :  { %978 = vmatpush1.bf16.msra.mxu0 %v3634_v23 }
 0x127   :  { %1019 = vmatpush1.bf16.msra.mxu1 %v3646_v25  ;;  %979 = vmatprep.subr.bf16.mxu0 %v3640_v24 }
 0x128   :  { %1020 = vmatprep.subr.bf16.mxu1 %v3656_v27 }
 0x12a   :  { %980 = vmatpush1.bf16.msra.mxu0 %v3651_v26 }
 0x12b   :  { %1021 = vmatpush1.bf16.msra.mxu1 %v3668_v29  ;;  %981 = vmatprep.subr.bf16.mxu0 %v3662_v28 }
 0x12c   :  { %1022 = vmatprep.subr.bf16.mxu1 %v3674_v30 }
 0x12e   :  { %982 = vmatpush1.bf16.msra.mxu0 %v3680_v31 }
 0x12f   :  { %1023 = vmatpush1.bf16.msra.mxu1 %v3690_v33  ;;  %1337 = vmatprep.subr.bf16.mxu0 %v3503_v0 }
 0x130   :  { %1378 = vmatprep.subr.bf16.mxu1 %v3516_v3 }
 0x1d1   :  { %v631_v32 = vpop.f32.mrf.mxu0 }
 0x1d2   :  { %v672_v36 = vpop.f32.mrf.mxu1  ;;  %v679_v37 = vadd.f32 %v631_v32, %v400_v62 }
 0x1d3   :  { %v633_v38 = vpop.f32.mrf.mxu0  ;;  %v681_v47 = vadd.f32 %v672_v36, %v402_v41 }
 0x1d4   :  { %v674_v39 = vpop.f32.mrf.mxu1  ;;  %v683_v40 = vmul.f32 0.5, %v679_v37  ;;  %v680_v0 = vadd.f32 %v633_v38, %v401_v63 }
 0x1d5   :  { %v635_v42 = vpop.f32.mrf.mxu0  ;;  %v682_v49 = vadd.f32 %v674_v39, %v403_v48 }
 0x1d6   :  { %v676_v3 = vpop.f32.mrf.mxu1  ;;  %3403 = vtanh.f32 %v683_v40  ;;  %v687_v43 = vmul.f32 0.5, %v680_v0 }
 0x1d7   :  { %v636_v45 = vpop.f32.mrf.mxu0  ;;  %v692_v50 = vmul.f32 0.5, %v682_v49 }
 0x1d8   :  { %v677_v46 = vpop.f32.mrf.mxu1  ;;  %3405 = vtanh.f32 %v687_v43 }
 0x1d9   :  { %3407 = vtanh.f32 %v681_v47 }
 0x1da   :  { %3409 = vtanh.f32 %v692_v50 }
 0x1e3   :  { %v3404_v51 = vpop.eup %3403 }
 0x1e4   :  { %v685_v52 = vmul.f32 0.5, %v3404_v51 }
 0x1e5   :  { %v3406_v53 = vpop.eup %3405 }
 0x1e6   :  { %v686_v54 = vadd.f32 0.5, %v685_v52  ;;  %v689_v55 = vmul.f32 0.5, %v3406_v53  ;;  %v3408_v57 = vpop.eup %3407 }
 0x1e7   :  { %v3410_v61 = vpop.eup %3409 }
 0x1e8   :  { %v690_v56 = vadd.f32 0.5, %v689_v55  ;;  %v697_v59 = vmul.f32 %v3408_v57, %v686_v54  ;;  %v694_v62 = vmul.f32 0.5, %v3410_v61 }
 0x1ea   :  { %v696_v58 = vmul.f32 %v690_v56, %v3742_v35  ;;  %v695_v63 = vadd.f32 0.5, %v694_v62 }
 0x1ec   :  { %v3818_v60 = vadd.f32 %v697_v59, %v696_v58 }
 0x1ee   :  { %3411 = vtanh.f32 %v3818_v60 }
 0x1fb   :  { %v3412_v32 = vpop.eup %3411 }
 0x1fc   :  { %v700_v34 = vmul.f32 %v3412_v32, %v695_v63 }
 0x1fe   :  { %v702_v36 = vcombine.high %v700_v34, %v700_v34  ;;  %v709_v37 = vrot.slane %v700_v34, %v3745_v44  ;;  %v774_v38 = vpack.c.bf16 %v700_v34, %v700_v34 }
 0x200   :  { %v716_v39 = vrot.slane %v702_v36, %v3745_v44  ;;  %v717_v40 = vcombine.high %v709_v37, %v709_v37  ;;  %v725_v41 = vrot.slane %v709_v37, %v3745_v44  ;;  %3063 = vst.sshfl [vmem:[%s4420_s4 + $0x1] sm:$0x1 pattern:$0x73625140] %v709_v37  ;;  %1000 = vmatmul.mubr.bf16.vlgmr.msra.gmra.mxu0 %v774_v38 }
 0x201   :  { %1041 = vmatmul.mubr.bf16.vlgmr.msra.gmra.mxu1 %v774_v38  ;;  %1338 = vmatpush1.bf16.msra.mxu0 %v3510_v2  ;;  %v3928_v38 = vld [vmem:[%s4416_s1 + $0xe4] ss:$16 sps:$4 sm:$0xff]  }
 0x202   :  { %1379 = vmatpush1.bf16.msra.mxu1 %v3521_v4  ;;  %v718_v35 = vcombine.high %v716_v39, %v716_v39  ;;  %v732_v0 = vrot.slane %v716_v39, %v3745_v44  ;;  %v739_v42 = vrot.slane %v717_v40, %v3745_v44  ;;  %v747_v3 = vcombine.high %v725_v41, %v725_v41  ;;  %v3943_v41 = vld [vmem:[%s4416_s1 + $0xe8] ss:$16 sps:$4 sm:$0xff]  }
 0x203   :  { %3064 = vst.sshfl [vmem:[%s4420_s4 + $0x9] sm:$0x1 pattern:$0x73625140] %v717_v40  ;;  %1339 = vmatprep.subr.bf16.mxu0 %v3527_v5  ;;  %1380 = vmatprep.subr.bf16.mxu1 %v3538_v7  ;;  %v3938_v40 = vld [vmem:[%s4416_s1 + $0xe0] ss:$16 sps:$4 sm:$0xff]  }
 0x204   :  { %3065 = vst.sshfl [vmem:[%s4420_s4 + $0x21] sm:$0x1 pattern:$0x73625140] %v716_v39  ;;  %1369 = vmatprep.mubr.bf16.mxu0 %v3473_v1  ;;  %v746_v2 = vrot.slane %v718_v35, %v3745_v44  ;;  %v748_v4 = vcombine.high %v732_v0, %v732_v0  ;;  %v749_v43 = vcombine.high %v739_v42, %v739_v42  ;;  %761 = vst [vmem:[%s4420_s4 + $0x11] sm:$0x1] %v747_v3 }
 0x205   :  { %3066 = vst.sshfl [vmem:[%s4420_s4 + $0x29] sm:$0x1 pattern:$0x73625140] %v718_v35  ;;  %1410 = vmatprep.mubr.bf16.mxu1 %v3473_v1  ;;  %1340 = vmatpush1.bf16.msra.mxu0 %v3532_v6  ;;  %v3067_v6 = vld [vmem:[%s4418_s0 + $0x20] sm:$0xff] }
 0x206   :  { %1381 = vmatpush1.bf16.msra.mxu1 %v3545_v8  ;;  %v750_v5 = vcombine.high %v746_v2, %v746_v2  ;;  %762 = vst [vmem:[%s4420_s4 + $0x19] sm:$0x1] %v749_v43  ;;  %765 = vst [vmem:[%s4420_s4 + $0x31] sm:$0x1] %v748_v4  ;;  %1341 = vmatprep.subr.bf16.mxu0 %v3551_v9  ;;  %v770_v7 = vunpack.c.l.bf16 %v3067_v6  ;;  %v771_v8 = vunpack.c.h.bf16 %v3067_v6  ;;  %v3933_v39 = vld [vmem:[%s4416_s1 + $0xec] ss:$16 sps:$4 sm:$0xff]  }
 0x207   :  { %1382 = vmatprep.subr.bf16.mxu1 %v3562_v11  ;;  %v3952_v35 = vld [vmem:[%s4416_s1 + $0xc4] ss:$16 sps:$4 sm:$0xff]   ;;  %v3957_v0 = vld [vmem:[%s4416_s1 + $0xcc] ss:$16 sps:$4 sm:$0xff]   ;;  %v3962_v42 = vld [vmem:[%s4416_s1 + $0xc0] ss:$16 sps:$4 sm:$0xff]  }
 0x208   :  { %766 = vst [vmem:[%s4420_s4 + $0x39] sm:$0x1] %v750_v5  ;;  %v3967_v3 = vld [vmem:[%s4416_s1 + $0xc8] ss:$16 sps:$4 sm:$0xff]   ;;  %v3976_v2 = vld [vmem:[%s4416_s1 + $0xa4] ss:$16 sps:$4 sm:$0xff]  }
 0x209   :  { %1342 = vmatpush1.bf16.msra.mxu0 %v3557_v10  ;;  %v3068_v10 = vld [vmem:[%s4418_s0 + $0x28] sm:$0xff]  ;;  %v3986_v43 = vld [vmem:[%s4416_s1 + $0xa0] ss:$16 sps:$4 sm:$0xff]   ;;  %v4000_v6 = vld [vmem:[%s4416_s1 + $0x84] ss:$16 sps:$4 sm:$0xff]  }
 0x20a   :  { %1383 = vmatpush1.bf16.msra.mxu1 %v3574_v13  ;;  %1343 = vmatprep.subr.bf16.mxu0 %v3568_v12  ;;  %v3981_v4 = vld [vmem:[%s4416_s1 + $0xac] ss:$16 sps:$4 sm:$0xff]   ;;  %v3991_v5 = vld [vmem:[%s4416_s1 + $0xa8] ss:$16 sps:$4 sm:$0xff]  }
 0x20b   :  { %1384 = vmatprep.subr.bf16.mxu1 %v3580_v14 }
 0x20d   :  { %1344 = vmatpush1.bf16.msra.mxu0 %v3586_v15 }
 0x20e   :  { %1385 = vmatpush1.bf16.msra.mxu1 %v3598_v17  ;;  %1345 = vmatprep.subr.bf16.mxu0 %v3592_v16  ;;  %v772_v16 = vunpack.c.l.bf16 %v3068_v10 }
 0x20f   :  { %1386 = vmatprep.subr.bf16.mxu1 %v3604_v18 }
 0x211   :  { %1346 = vmatpush1.bf16.msra.mxu0 %v3610_v19 }
 0x212   :  { %1387 = vmatpush1.bf16.msra.mxu1 %v3622_v21  ;;  %1347 = vmatprep.subr.bf16.mxu0 %v3616_v20 }
 0x213   :  { %1388 = vmatprep.subr.bf16.mxu1 %v3628_v22 }
 0x215   :  { %1348 = vmatpush1.bf16.msra.mxu0 %v3634_v23 }
 0x216   :  { %1389 = vmatpush1.bf16.msra.mxu1 %v3646_v25  ;;  %1349 = vmatprep.subr.bf16.mxu0 %v3640_v24  ;;  %v773_v24 = vunpack.c.h.bf16 %v3068_v10  ;;  %v4024_v10 = vld [vmem:[%s4416_s1 + $0x64] ss:$16 sps:$4 sm:$0xff]  }
 0x217   :  { %1390 = vmatprep.subr.bf16.mxu1 %v3656_v27 }
 0x219   :  { %1350 = vmatpush1.bf16.msra.mxu0 %v3651_v26 }
 0x21a   :  { %1391 = vmatpush1.bf16.msra.mxu1 %v3668_v29  ;;  %1351 = vmatprep.subr.bf16.mxu0 %v3662_v28 }
 0x21b   :  { %1392 = vmatprep.subr.bf16.mxu1 %v3674_v30 }
 0x21d   :  { %1352 = vmatpush1.bf16.msra.mxu0 %v3680_v31 }
 0x21e   :  { %1393 = vmatpush1.bf16.msra.mxu1 %v3690_v33  ;;  %1707 = vmatprep.subr.bf16.mxu0 %v3928_v38 }
 0x21f   :  { %1748 = vmatprep.subr.bf16.mxu1 %v3933_v39 }
 0x2c0   :  { %v1001_v9 = vpop.f32.mrf.mxu0 }
 0x2c1   :  { %v1042_v11 = vpop.f32.mrf.mxu1  ;;  %v1049_v12 = vadd.f32 %v1001_v9, %v770_v7  ;;  %v4005_v7 = vld [vmem:[%s4416_s1 + $0x8c] ss:$16 sps:$4 sm:$0xff]   ;;  %v4015_v9 = vld [vmem:[%s4416_s1 + $0x88] ss:$16 sps:$4 sm:$0xff]  }
 0x2c2   :  { %v1003_v13 = vpop.f32.mrf.mxu0  ;;  %v1051_v23 = vadd.f32 %v1042_v11, %v772_v16  ;;  %v4029_v11 = vld [vmem:[%s4416_s1 + $0x6c] ss:$16 sps:$4 sm:$0xff]   ;;  %v4058_v16 = vld [vmem:[%s4416_s1 + $0x40] ss:$16 sps:$4 sm:$0xff]  }
 0x2c3   :  { %v1044_v14 = vpop.f32.mrf.mxu1  ;;  %v1053_v15 = vmul.f32 0.5, %v1049_v12  ;;  %v1050_v17 = vadd.f32 %v1003_v13, %v771_v8  ;;  %v4010_v8 = vld [vmem:[%s4416_s1 + $0x80] ss:$16 sps:$4 sm:$0xff]   ;;  %v4039_v13 = vld [vmem:[%s4416_s1 + $0x68] ss:$16 sps:$4 sm:$0xff]  }
 0x2c4   :  { %v1005_v18 = vpop.f32.mrf.mxu0  ;;  %v1052_v25 = vadd.f32 %v1044_v14, %v773_v24  ;;  %v4034_v12 = vld [vmem:[%s4416_s1 + $0x60] ss:$16 sps:$4 sm:$0xff]   ;;  %v4048_v14 = vld [vmem:[%s4416_s1 + $0x44] ss:$16 sps:$4 sm:$0xff]  }
 0x2c5   :  { %v1046_v19 = vpop.f32.mrf.mxu1  ;;  %3413 = vtanh.f32 %v1053_v15  ;;  %v1057_v20 = vmul.f32 0.5, %v1050_v17  ;;  %v4053_v15 = vld [vmem:[%s4416_s1 + $0x4c] ss:$16 sps:$4 sm:$0xff]   ;;  %v4063_v17 = vld [vmem:[%s4416_s1 + $0x48] ss:$16 sps:$4 sm:$0xff]  }
 0x2c6   :  { %v1006_v21 = vpop.f32.mrf.mxu0  ;;  %v1062_v26 = vmul.f32 0.5, %v1052_v25  ;;  %v4072_v18 = vld [vmem:[%s4416_s1 + $0x24] ss:$16 sps:$4 sm:$0xff]   ;;  %v4077_v19 = vld [vmem:[%s4416_s1 + $0x2c] ss:$16 sps:$4 sm:$0xff]  }
 0x2c7   :  { %v1047_v22 = vpop.f32.mrf.mxu1  ;;  %3415 = vtanh.f32 %v1057_v20  ;;  %v4082_v20 = vld [vmem:[%s4416_s1 + $0x20] ss:$16 sps:$4 sm:$0xff]   ;;  %v4087_v21 = vld [vmem:[%s4416_s1 + $0x28] ss:$16 sps:$4 sm:$0xff]  }
 0x2c8   :  { %3417 = vtanh.f32 %v1051_v23  ;;  %v4096_v22 = vld [vmem:[%s4416_s1 + $0x4] ss:$16 sps:$4 sm:$0xff]   ;;  %v4101_v23 = vld [vmem:[%s4416_s1 + $0xc] ss:$16 sps:$4 sm:$0xff]   ;;  %v4106_v24 = vld [vmem:[%s4416_s1] ss:$16 sps:$4 sm:$0xff]  }
 0x2c9   :  { %3419 = vtanh.f32 %v1062_v26  ;;  %v4111_v25 = vld [vmem:[%s4416_s1 + $0x8] ss:$16 sps:$4 sm:$0xff]   ;;  %v3105_v26 = vld [vmem:[%s4418_s0 + $0x30] sm:$0xff] }
 0x2d2   :  { %v3414_v27 = vpop.eup %3413 }
 0x2d3   :  { %v1055_v28 = vmul.f32 0.5, %v3414_v27  ;;  %v1140_v27 = vunpack.c.l.bf16 %v3105_v26 }
 0x2d4   :  { %v3416_v29 = vpop.eup %3415 }
 0x2d5   :  { %v1056_v30 = vadd.f32 0.5, %v1055_v28  ;;  %v1059_v31 = vmul.f32 0.5, %v3416_v29  ;;  %v3418_v45 = vpop.eup %3417  ;;  %v1141_v28 = vunpack.c.h.bf16 %v3105_v26 }
 0x2d6   :  { %v3420_v49 = vpop.eup %3419 }
 0x2d7   :  { %v1060_v33 = vadd.f32 0.5, %v1059_v31  ;;  %v1067_v47 = vmul.f32 %v3418_v45, %v1056_v30  ;;  %v1064_v50 = vmul.f32 0.5, %v3420_v49  ;;  %v3106_v30 = vld [vmem:[%s4418_s0 + $0x38] sm:$0xff] }
 0x2d8   :  { %v1142_v49 = vunpack.c.l.bf16 %v3106_v30 }
 0x2d9   :  { %v1066_v46 = vmul.f32 %v1060_v33, %v3818_v60  ;;  %v1065_v51 = vadd.f32 0.5, %v1064_v50 }
 0x2db   :  { %v3890_v48 = vadd.f32 %v1067_v47, %v1066_v46 }
 0x2dd   :  { %3421 = vtanh.f32 %v3890_v48 }
 0x2ea   :  { %v3422_v52 = vpop.eup %3421 }
 0x2eb   :  { %v1070_v53 = vmul.f32 %v3422_v52, %v1065_v51 }
 0x2ed   :  { %v1072_v54 = vcombine.high %v1070_v53, %v1070_v53  ;;  %v1079_v55 = vrot.slane %v1070_v53, %v3745_v44  ;;  %v1144_v56 = vpack.c.bf16 %v1070_v53, %v1070_v53 }
 0x2ef   :  { %v1086_v57 = vrot.slane %v1072_v54, %v3745_v44  ;;  %v1087_v58 = vcombine.high %v1079_v55, %v1079_v55  ;;  %v1095_v59 = vrot.slane %v1079_v55, %v3745_v44  ;;  %3101 = vst.sshfl [vmem:[%s4420_s4 + $0x2] sm:$0x1 pattern:$0x73625140] %v1079_v55  ;;  %1370 = vmatmul.mubr.bf16.vlgmr.msra.gmra.mxu0 %v1144_v56 }
 0x2f0   :  { %1411 = vmatmul.mubr.bf16.vlgmr.msra.gmra.mxu1 %v1144_v56  ;;  %1739 = vmatprep.mubr.bf16.mxu0 %v3473_v1 }
 0x2f1   :  { %1780 = vmatprep.mubr.bf16.mxu1 %v3473_v1  ;;  %v1088_v60 = vcombine.high %v1086_v57, %v1086_v57  ;;  %v1102_v61 = vrot.slane %v1086_v57, %v3745_v44  ;;  %v1109_v62 = vrot.slane %v1087_v58, %v3745_v44  ;;  %v1117_v63 = vcombine.high %v1095_v59, %v1095_v59 }
 0x2f2   :  { %3102 = vst.sshfl [vmem:[%s4420_s4 + $0xa] sm:$0x1 pattern:$0x73625140] %v1087_v58  ;;  %1708 = vmatpush1.bf16.msra.mxu0 %v3938_v40  ;;  %1749 = vmatpush1.bf16.msra.mxu1 %v3943_v41 }
 0x2f3   :  { %3103 = vst.sshfl [vmem:[%s4420_s4 + $0x22] sm:$0x1 pattern:$0x73625140] %v1086_v57  ;;  %v1116_v32 = vrot.slane %v1088_v60, %v3745_v44  ;;  %v1118_v34 = vcombine.high %v1102_v61, %v1102_v61  ;;  %v1119_v36 = vcombine.high %v1109_v62, %v1109_v62  ;;  %1131 = vst [vmem:[%s4420_s4 + $0x12] sm:$0x1] %v1117_v63  ;;  %1709 = vmatprep.subr.bf16.mxu0 %v3952_v35 }
 0x2f4   :  { %3104 = vst.sshfl [vmem:[%s4420_s4 + $0x2a] sm:$0x1 pattern:$0x73625140] %v1088_v60  ;;  %1750 = vmatprep.subr.bf16.mxu1 %v3957_v0  ;;  %v1143_v57 = vunpack.c.h.bf16 %v3106_v30 }
 0x2f5   :  { %v1120_v37 = vcombine.high %v1116_v32, %v1116_v32  ;;  %1132 = vst [vmem:[%s4420_s4 + $0x1a] sm:$0x1] %v1119_v36  ;;  %1135 = vst [vmem:[%s4420_s4 + $0x32] sm:$0x1] %v1118_v34 }
 0x2f6   :  { %1710 = vmatpush1.bf16.msra.mxu0 %v3962_v42  ;;  %1751 = vmatpush1.bf16.msra.mxu1 %v3967_v3 }
 0x2f7   :  { %1136 = vst [vmem:[%s4420_s4 + $0x3a] sm:$0x1] %v1120_v37  ;;  %1711 = vmatprep.subr.bf16.mxu0 %v3976_v2  ;;  %1752 = vmatprep.subr.bf16.mxu1 %v3981_v4 }
 0x2fa   :  { %1712 = vmatpush1.bf16.msra.mxu0 %v3986_v43  ;;  %1753 = vmatpush1.bf16.msra.mxu1 %v3991_v5 }
 0x2fb   :  { %1713 = vmatprep.subr.bf16.mxu0 %v4000_v6  ;;  %1754 = vmatprep.subr.bf16.mxu1 %v4005_v7 }
 0x2fe   :  { %1714 = vmatpush1.bf16.msra.mxu0 %v4010_v8  ;;  %1755 = vmatpush1.bf16.msra.mxu1 %v4015_v9 }
 0x2ff   :  { %1715 = vmatprep.subr.bf16.mxu0 %v4024_v10  ;;  %1756 = vmatprep.subr.bf16.mxu1 %v4029_v11 }
 0x302   :  { %1716 = vmatpush1.bf16.msra.mxu0 %v4034_v12  ;;  %1757 = vmatpush1.bf16.msra.mxu1 %v4039_v13 }
 0x303   :  { %1717 = vmatprep.subr.bf16.mxu0 %v4048_v14  ;;  %1758 = vmatprep.subr.bf16.mxu1 %v4053_v15 }
 0x306   :  { %1718 = vmatpush1.bf16.msra.mxu0 %v4058_v16  ;;  %1759 = vmatpush1.bf16.msra.mxu1 %v4063_v17 }
 0x307   :  { %1719 = vmatprep.subr.bf16.mxu0 %v4072_v18  ;;  %1760 = vmatprep.subr.bf16.mxu1 %v4077_v19 }
 0x30a   :  { %1720 = vmatpush1.bf16.msra.mxu0 %v4082_v20  ;;  %1761 = vmatpush1.bf16.msra.mxu1 %v4087_v21 }
 0x30b   :  { %1721 = vmatprep.subr.bf16.mxu0 %v4096_v22  ;;  %1762 = vmatprep.subr.bf16.mxu1 %v4101_v23 }
 0x30e   :  { %1722 = vmatpush1.bf16.msra.mxu0 %v4106_v24  ;;  %1763 = vmatpush1.bf16.msra.mxu1 %v4111_v25 }
 0x30f   :  { %2077 = vmatprep.subr.bf16.mxu0 %v3928_v38  ;;  %2118 = vmatprep.subr.bf16.mxu1 %v3933_v39 }
 0x3af   :  { %v1371_v29 = vpop.f32.mrf.mxu0 }
 0x3b0   :  { %v1412_v31 = vpop.f32.mrf.mxu1  ;;  %v1419_v33 = vadd.f32 %v1371_v29, %v1140_v27 }
 0x3b1   :  { %v1373_v45 = vpop.f32.mrf.mxu0  ;;  %v1421_v56 = vadd.f32 %v1412_v31, %v1142_v49 }
 0x3b2   :  { %v1414_v46 = vpop.f32.mrf.mxu1  ;;  %v1423_v47 = vmul.f32 0.5, %v1419_v33  ;;  %v1420_v50 = vadd.f32 %v1373_v45, %v1141_v28 }
 0x3b3   :  { %v1375_v51 = vpop.f32.mrf.mxu0  ;;  %v1422_v58 = vadd.f32 %v1414_v46, %v1143_v57 }
 0x3b4   :  { %v1416_v52 = vpop.f32.mrf.mxu1  ;;  %3423 = vtanh.f32 %v1423_v47  ;;  %v1427_v53 = vmul.f32 0.5, %v1420_v50 }
 0x3b5   :  { %v1376_v54 = vpop.f32.mrf.mxu0  ;;  %v1432_v59 = vmul.f32 0.5, %v1422_v58 }
 0x3b6   :  { %v1417_v55 = vpop.f32.mrf.mxu1  ;;  %3425 = vtanh.f32 %v1427_v53 }
 0x3b7   :  { %3427 = vtanh.f32 %v1421_v56 }
 0x3b8   :  { %3429 = vtanh.f32 %v1432_v59  ;;  %v3143_v59 = vld [vmem:[%s4418_s0 + $0x40] sm:$0xff] }
 0x3c1   :  { %v3424_v60 = vpop.eup %3423 }
 0x3c2   :  { %v1425_v61 = vmul.f32 0.5, %v3424_v60  ;;  %v1510_v60 = vunpack.c.l.bf16 %v3143_v59 }
 0x3c3   :  { %v3426_v62 = vpop.eup %3425 }
 0x3c4   :  { %v1426_v63 = vadd.f32 0.5, %v1425_v61  ;;  %v1429_v32 = vmul.f32 0.5, %v3426_v62  ;;  %v3428_v36 = vpop.eup %3427  ;;  %v1511_v61 = vunpack.c.h.bf16 %v3143_v59 }
 0x3c5   :  { %v3430_v28 = vpop.eup %3429 }
 0x3c6   :  { %v1430_v34 = vadd.f32 0.5, %v1429_v32  ;;  %v1437_v26 = vmul.f32 %v3428_v36, %v1426_v63  ;;  %v1434_v29 = vmul.f32 0.5, %v3430_v28  ;;  %v3144_v63 = vld [vmem:[%s4418_s0 + $0x48] sm:$0xff] }
 0x3c7   :  { %v1512_v28 = vunpack.c.l.bf16 %v3144_v63 }
 0x3c8   :  { %v1436_v37 = vmul.f32 %v1430_v34, %v3890_v48  ;;  %v1435_v30 = vadd.f32 0.5, %v1434_v29 }
 0x3ca   :  { %v4126_v27 = vadd.f32 %v1437_v26, %v1436_v37 }
 0x3cc   :  { %3431 = vtanh.f32 %v4126_v27 }
 0x3d9   :  { %v3432_v31 = vpop.eup %3431 }
 0x3da   :  { %v1440_v33 = vmul.f32 %v3432_v31, %v1435_v30 }
 0x3dc   :  { %v1442_v45 = vcombine.high %v1440_v33, %v1440_v33  ;;  %v1449_v46 = vrot.slane %v1440_v33, %v3745_v44  ;;  %v1514_v47 = vpack.c.bf16 %v1440_v33, %v1440_v33 }
 0x3de   :  { %v1456_v49 = vrot.slane %v1442_v45, %v3745_v44  ;;  %v1457_v50 = vcombine.high %v1449_v46, %v1449_v46  ;;  %v1465_v51 = vrot.slane %v1449_v46, %v3745_v44  ;;  %3139 = vst.sshfl [vmem:[%s4420_s4 + $0x3] sm:$0x1 pattern:$0x73625140] %v1449_v46  ;;  %1740 = vmatmul.mubr.bf16.vlgmr.msra.gmra.mxu0 %v1514_v47 }
 0x3df   :  { %1781 = vmatmul.mubr.bf16.vlgmr.msra.gmra.mxu1 %v1514_v47  ;;  %2078 = vmatpush1.bf16.msra.mxu0 %v3938_v40 }
 0x3e0   :  { %2119 = vmatpush1.bf16.msra.mxu1 %v3943_v41  ;;  %v1458_v48 = vcombine.high %v1456_v49, %v1456_v49  ;;  %v1472_v52 = vrot.slane %v1456_v49, %v3745_v44  ;;  %v1479_v53 = vrot.slane %v1457_v50, %v3745_v44  ;;  %v1487_v54 = vcombine.high %v1465_v51, %v1465_v51 }
 0x3e1   :  { %3140 = vst.sshfl [vmem:[%s4420_s4 + $0xb] sm:$0x1 pattern:$0x73625140] %v1457_v50  ;;  %2079 = vmatprep.subr.bf16.mxu0 %v3952_v35  ;;  %2120 = vmatprep.subr.bf16.mxu1 %v3957_v0 }
 0x3e2   :  { %3141 = vst.sshfl [vmem:[%s4420_s4 + $0x23] sm:$0x1 pattern:$0x73625140] %v1456_v49  ;;  %2109 = vmatprep.mubr.bf16.mxu0 %v3473_v1  ;;  %v1486_v55 = vrot.slane %v1458_v48, %v3745_v44  ;;  %v1488_v56 = vcombine.high %v1472_v52, %v1472_v52  ;;  %v1489_v57 = vcombine.high %v1479_v53, %v1479_v53  ;;  %1501 = vst [vmem:[%s4420_s4 + $0x13] sm:$0x1] %v1487_v54 }
 0x3e3   :  { %3142 = vst.sshfl [vmem:[%s4420_s4 + $0x2b] sm:$0x1 pattern:$0x73625140] %v1458_v48  ;;  %2150 = vmatprep.mubr.bf16.mxu1 %v3473_v1  ;;  %2080 = vmatpush1.bf16.msra.mxu0 %v3962_v42  ;;  %v1513_v49 = vunpack.c.h.bf16 %v3144_v63 }
 0x3e4   :  { %2121 = vmatpush1.bf16.msra.mxu1 %v3967_v3  ;;  %v1490_v58 = vcombine.high %v1486_v55, %v1486_v55  ;;  %1502 = vst [vmem:[%s4420_s4 + $0x1b] sm:$0x1] %v1489_v57  ;;  %1505 = vst [vmem:[%s4420_s4 + $0x33] sm:$0x1] %v1488_v56  ;;  %2081 = vmatprep.subr.bf16.mxu0 %v3976_v2 }
 0x3e5   :  { %2122 = vmatprep.subr.bf16.mxu1 %v3981_v4 }
 0x3e6   :  { %1506 = vst [vmem:[%s4420_s4 + $0x3b] sm:$0x1] %v1490_v58 }
 0x3e7   :  { %2082 = vmatpush1.bf16.msra.mxu0 %v3986_v43 }
 0x3e8   :  { %2123 = vmatpush1.bf16.msra.mxu1 %v3991_v5  ;;  %2083 = vmatprep.subr.bf16.mxu0 %v4000_v6 }
 0x3e9   :  { %2124 = vmatprep.subr.bf16.mxu1 %v4005_v7 }
 0x3eb   :  { %2084 = vmatpush1.bf16.msra.mxu0 %v4010_v8 }
 0x3ec   :  { %2125 = vmatpush1.bf16.msra.mxu1 %v4015_v9  ;;  %2085 = vmatprep.subr.bf16.mxu0 %v4024_v10 }
 0x3ed   :  { %2126 = vmatprep.subr.bf16.mxu1 %v4029_v11 }
 0x3ef   :  { %2086 = vmatpush1.bf16.msra.mxu0 %v4034_v12 }
 0x3f0   :  { %2127 = vmatpush1.bf16.msra.mxu1 %v4039_v13  ;;  %2087 = vmatprep.subr.bf16.mxu0 %v4048_v14 }
 0x3f1   :  { %2128 = vmatprep.subr.bf16.mxu1 %v4053_v15 }
 0x3f3   :  { %2088 = vmatpush1.bf16.msra.mxu0 %v4058_v16 }
 0x3f4   :  { %2129 = vmatpush1.bf16.msra.mxu1 %v4063_v17  ;;  %2089 = vmatprep.subr.bf16.mxu0 %v4072_v18 }
 0x3f5   :  { %2130 = vmatprep.subr.bf16.mxu1 %v4077_v19 }
 0x3f7   :  { %2090 = vmatpush1.bf16.msra.mxu0 %v4082_v20 }
 0x3f8   :  { %2131 = vmatpush1.bf16.msra.mxu1 %v4087_v21  ;;  %2091 = vmatprep.subr.bf16.mxu0 %v4096_v22 }
 0x3f9   :  { %2132 = vmatprep.subr.bf16.mxu1 %v4101_v23 }
 0x3fb   :  { %2092 = vmatpush1.bf16.msra.mxu0 %v4106_v24 }
 0x3fc   :  { %2133 = vmatpush1.bf16.msra.mxu1 %v4111_v25  ;;  %2447 = vmatprep.subr.bf16.mxu0 %v3928_v38 }
 0x3fd   :  { %2488 = vmatprep.subr.bf16.mxu1 %v3933_v39 }
 0x49e   :  { %v1741_v62 = vpop.f32.mrf.mxu0 }
 0x49f   :  { %v1782_v32 = vpop.f32.mrf.mxu1  ;;  %v1789_v34 = vadd.f32 %v1741_v62, %v1510_v60 }
 0x4a0   :  { %v1743_v36 = vpop.f32.mrf.mxu0  ;;  %v1791_v47 = vadd.f32 %v1782_v32, %v1512_v28 }
 0x4a1   :  { %v1784_v37 = vpop.f32.mrf.mxu1  ;;  %v1793_v26 = vmul.f32 0.5, %v1789_v34  ;;  %v1790_v29 = vadd.f32 %v1743_v36, %v1511_v61 }
 0x4a2   :  { %v1745_v30 = vpop.f32.mrf.mxu0  ;;  %v1792_v50 = vadd.f32 %v1784_v37, %v1513_v49 }
 0x4a3   :  { %v1786_v31 = vpop.f32.mrf.mxu1  ;;  %3433 = vtanh.f32 %v1793_v26  ;;  %v1797_v33 = vmul.f32 0.5, %v1790_v29 }
 0x4a4   :  { %v1746_v45 = vpop.f32.mrf.mxu0  ;;  %v1802_v51 = vmul.f32 0.5, %v1792_v50 }
 0x4a5   :  { %v1787_v46 = vpop.f32.mrf.mxu1  ;;  %3435 = vtanh.f32 %v1797_v33 }
 0x4a6   :  { %3437 = vtanh.f32 %v1791_v47 }
 0x4a7   :  { %3439 = vtanh.f32 %v1802_v51  ;;  %v3181_v51 = vld [vmem:[%s4418_s0 + $0x50] sm:$0xff] }
 0x4b0   :  { %v3434_v48 = vpop.eup %3433 }
 0x4b1   :  { %v1795_v52 = vmul.f32 0.5, %v3434_v48  ;;  %v1880_v48 = vunpack.c.l.bf16 %v3181_v51 }
 0x4b2   :  { %v3436_v53 = vpop.eup %3435 }
 0x4b3   :  { %v1796_v54 = vadd.f32 0.5, %v1795_v52  ;;  %v1799_v55 = vmul.f32 0.5, %v3436_v53  ;;  %v3438_v57 = vpop.eup %3437  ;;  %v1881_v52 = vunpack.c.h.bf16 %v3181_v51 }
 0x4b4   :  { %v3440_v61 = vpop.eup %3439 }
 0x4b5   :  { %v1800_v56 = vadd.f32 0.5, %v1799_v55  ;;  %v1807_v59 = vmul.f32 %v3438_v57, %v1796_v54  ;;  %v1804_v62 = vmul.f32 0.5, %v3440_v61  ;;  %v3182_v54 = vld [vmem:[%s4418_s0 + $0x58] sm:$0xff] }
 0x4b6   :  { %v1882_v61 = vunpack.c.l.bf16 %v3182_v54 }
 0x4b7   :  { %v1806_v58 = vmul.f32 %v1800_v56, %v4126_v27  ;;  %v1805_v63 = vadd.f32 0.5, %v1804_v62 }
 0x4b9   :  { %v4200_v60 = vadd.f32 %v1807_v59, %v1806_v58 }
 0x4bb   :  { %3441 = vtanh.f32 %v4200_v60 }
 0x4c8   :  { %v3442_v32 = vpop.eup %3441 }
 0x4c9   :  { %v1810_v34 = vmul.f32 %v3442_v32, %v1805_v63 }
 0x4cb   :  { %v1812_v36 = vcombine.high %v1810_v34, %v1810_v34  ;;  %v1819_v37 = vrot.slane %v1810_v34, %v3745_v44  ;;  %v1884_v26 = vpack.c.bf16 %v1810_v34, %v1810_v34 }
 0x4cd   :  { %v1826_v28 = vrot.slane %v1812_v36, %v3745_v44  ;;  %v1827_v29 = vcombine.high %v1819_v37, %v1819_v37  ;;  %v1835_v30 = vrot.slane %v1819_v37, %v3745_v44  ;;  %3177 = vst.sshfl [vmem:[%s4420_s4 + $0x4] sm:$0x1 pattern:$0x73625140] %v1819_v37  ;;  %2110 = vmatmul.mubr.bf16.vlgmr.msra.gmra.mxu0 %v1884_v26  ;;  %v1883_v37 = vunpack.c.h.bf16 %v3182_v54 }
 0x4ce   :  { %2151 = vmatmul.mubr.bf16.vlgmr.msra.gmra.mxu1 %v1884_v26  ;;  %2448 = vmatpush1.bf16.msra.mxu0 %v3938_v40 }
 0x4cf   :  { %2489 = vmatpush1.bf16.msra.mxu1 %v3943_v41  ;;  %v1828_v27 = vcombine.high %v1826_v28, %v1826_v28  ;;  %v1842_v31 = vrot.slane %v1826_v28, %v3745_v44  ;;  %v1849_v33 = vrot.slane %v1827_v29, %v3745_v44  ;;  %v1857_v45 = vcombine.high %v1835_v30, %v1835_v30 }
 0x4d0   :  { %3178 = vst.sshfl [vmem:[%s4420_s4 + $0xc] sm:$0x1 pattern:$0x73625140] %v1827_v29  ;;  %2449 = vmatprep.subr.bf16.mxu0 %v3952_v35  ;;  %2490 = vmatprep.subr.bf16.mxu1 %v3957_v0 }
 0x4d1   :  { %3179 = vst.sshfl [vmem:[%s4420_s4 + $0x24] sm:$0x1 pattern:$0x73625140] %v1826_v28  ;;  %2479 = vmatprep.mubr.bf16.mxu0 %v3473_v1  ;;  %v1856_v46 = vrot.slane %v1828_v27, %v3745_v44  ;;  %v1858_v47 = vcombine.high %v1842_v31, %v1842_v31  ;;  %v1859_v49 = vcombine.high %v1849_v33, %v1849_v33  ;;  %1871 = vst [vmem:[%s4420_s4 + $0x14] sm:$0x1] %v1857_v45 }
 0x4d2   :  { %3180 = vst.sshfl [vmem:[%s4420_s4 + $0x2c] sm:$0x1 pattern:$0x73625140] %v1828_v27  ;;  %2520 = vmatprep.mubr.bf16.mxu1 %v3473_v1  ;;  %2450 = vmatpush1.bf16.msra.mxu0 %v3962_v42 }
 0x4d3   :  { %2491 = vmatpush1.bf16.msra.mxu1 %v3967_v3  ;;  %v1860_v50 = vcombine.high %v1856_v46, %v1856_v46  ;;  %1872 = vst [vmem:[%s4420_s4 + $0x1c] sm:$0x1] %v1859_v49  ;;  %1875 = vst [vmem:[%s4420_s4 + $0x34] sm:$0x1] %v1858_v47  ;;  %2451 = vmatprep.subr.bf16.mxu0 %v3976_v2 }
 0x4d4   :  { %2492 = vmatprep.subr.bf16.mxu1 %v3981_v4 }
 0x4d5   :  { %1876 = vst [vmem:[%s4420_s4 + $0x3c] sm:$0x1] %v1860_v50 }
 0x4d6   :  { %2452 = vmatpush1.bf16.msra.mxu0 %v3986_v43 }
 0x4d7   :  { %2493 = vmatpush1.bf16.msra.mxu1 %v3991_v5  ;;  %2453 = vmatprep.subr.bf16.mxu0 %v4000_v6 }
 0x4d8   :  { %2494 = vmatprep.subr.bf16.mxu1 %v4005_v7 }
 0x4da   :  { %2454 = vmatpush1.bf16.msra.mxu0 %v4010_v8 }
 0x4db   :  { %2495 = vmatpush1.bf16.msra.mxu1 %v4015_v9  ;;  %2455 = vmatprep.subr.bf16.mxu0 %v4024_v10 }
 0x4dc   :  { %2496 = vmatprep.subr.bf16.mxu1 %v4029_v11 }
 0x4de   :  { %2456 = vmatpush1.bf16.msra.mxu0 %v4034_v12 }
 0x4df   :  { %2497 = vmatpush1.bf16.msra.mxu1 %v4039_v13  ;;  %2457 = vmatprep.subr.bf16.mxu0 %v4048_v14 }
 0x4e0   :  { %2498 = vmatprep.subr.bf16.mxu1 %v4053_v15 }
 0x4e2   :  { %2458 = vmatpush1.bf16.msra.mxu0 %v4058_v16 }
 0x4e3   :  { %2499 = vmatpush1.bf16.msra.mxu1 %v4063_v17  ;;  %2459 = vmatprep.subr.bf16.mxu0 %v4072_v18 }
 0x4e4   :  { %2500 = vmatprep.subr.bf16.mxu1 %v4077_v19 }
 0x4e6   :  { %2460 = vmatpush1.bf16.msra.mxu0 %v4082_v20 }
 0x4e7   :  { %2501 = vmatpush1.bf16.msra.mxu1 %v4087_v21  ;;  %2461 = vmatprep.subr.bf16.mxu0 %v4096_v22 }
 0x4e8   :  { %2502 = vmatprep.subr.bf16.mxu1 %v4101_v23 }
 0x4ea   :  { %2462 = vmatpush1.bf16.msra.mxu0 %v4106_v24 }
 0x4eb   :  { %2503 = vmatpush1.bf16.msra.mxu1 %v4111_v25  ;;  %2817 = vmatprep.subr.bf16.mxu0 %v3928_v38 }
 0x4ec   :  { %2858 = vmatprep.subr.bf16.mxu1 %v3933_v39 }
 0x58d   :  { %v2111_v53 = vpop.f32.mrf.mxu0 }
 0x58e   :  { %v2152_v55 = vpop.f32.mrf.mxu1  ;;  %v2159_v56 = vadd.f32 %v2111_v53, %v1880_v48 }
 0x58f   :  { %v2113_v57 = vpop.f32.mrf.mxu0  ;;  %v2161_v36 = vadd.f32 %v2152_v55, %v1882_v61 }
 0x590   :  { %v2154_v58 = vpop.f32.mrf.mxu1  ;;  %v2163_v59 = vmul.f32 0.5, %v2159_v56  ;;  %v2160_v38 = vadd.f32 %v2113_v57, %v1881_v52 }
 0x591   :  { %v2115_v62 = vpop.f32.mrf.mxu0  ;;  %v2162_v26 = vadd.f32 %v2154_v58, %v1883_v37 }
 0x592   :  { %v2156_v39 = vpop.f32.mrf.mxu1  ;;  %3443 = vtanh.f32 %v2163_v59  ;;  %v2167_v63 = vmul.f32 0.5, %v2160_v38 }
 0x593   :  { %v2116_v32 = vpop.f32.mrf.mxu0  ;;  %v2172_v28 = vmul.f32 0.5, %v2162_v26 }
 0x594   :  { %v2157_v34 = vpop.f32.mrf.mxu1  ;;  %3445 = vtanh.f32 %v2167_v63 }
 0x595   :  { %3447 = vtanh.f32 %v2161_v36 }
 0x596   :  { %3449 = vtanh.f32 %v2172_v28 }
 0x59f   :  { %v3444_v29 = vpop.eup %3443 }
 0x5a0   :  { %v2165_v30 = vmul.f32 0.5, %v3444_v29 }
 0x5a1   :  { %v3446_v27 = vpop.eup %3445 }
 0x5a2   :  { %v2166_v31 = vadd.f32 0.5, %v2165_v30  ;;  %v2169_v33 = vmul.f32 0.5, %v3446_v27  ;;  %v3448_v46 = vpop.eup %3447 }
 0x5a3   :  { %v3450_v51 = vpop.eup %3449 }
 0x5a4   :  { %v2170_v45 = vadd.f32 0.5, %v2169_v33  ;;  %v2177_v49 = vmul.f32 %v3448_v46, %v2166_v31  ;;  %v2174_v48 = vmul.f32 0.5, %v3450_v51 }
 0x5a6   :  { %v2176_v47 = vmul.f32 %v2170_v45, %v4200_v60  ;;  %v2175_v52 = vadd.f32 0.5, %v2174_v48 }
 0x5a8   :  { %v4274_v50 = vadd.f32 %v2177_v49, %v2176_v47 }
 0x5aa   :  { %3451 = vtanh.f32 %v4274_v50 }
 0x5b7   :  { %v3452_v53 = vpop.eup %3451 }
 0x5b8   :  { %v2180_v54 = vmul.f32 %v3452_v53, %v2175_v52 }
 0x5ba   :  { %v2182_v55 = vcombine.high %v2180_v54, %v2180_v54  ;;  %v2189_v56 = vrot.slane %v2180_v54, %v3745_v44  ;;  %v2254_v57 = vpack.c.bf16 %v2180_v54, %v2180_v54 }
 0x5bc   :  { %v2196_v58 = vrot.slane %v2182_v55, %v3745_v44  ;;  %v2197_v59 = vcombine.high %v2189_v56, %v2189_v56  ;;  %v2205_v61 = vrot.slane %v2189_v56, %v3745_v44  ;;  %3215 = vst.sshfl [vmem:[%s4420_s4 + $0x5] sm:$0x1 pattern:$0x73625140] %v2189_v56  ;;  %2480 = vmatmul.mubr.bf16.vlgmr.msra.gmra.mxu0 %v2254_v57  ;;  %v3257_v56 = vld [vmem:[%s4418_s0 + $0x70] sm:$0xff] }
 0x5bd   :  { %2521 = vmatmul.mubr.bf16.vlgmr.msra.gmra.mxu1 %v2254_v57  ;;  %2818 = vmatpush1.bf16.msra.mxu0 %v3938_v40  ;;  %v2620_v57 = vunpack.c.l.bf16 %v3257_v56 }
 0x5be   :  { %2859 = vmatpush1.bf16.msra.mxu1 %v3943_v41  ;;  %v2198_v60 = vcombine.high %v2196_v58, %v2196_v58  ;;  %v2212_v38 = vrot.slane %v2196_v58, %v3745_v44  ;;  %v2219_v62 = vrot.slane %v2197_v59, %v3745_v44  ;;  %v2227_v39 = vcombine.high %v2205_v61, %v2205_v61  ;;  %v3258_v61 = vld [vmem:[%s4418_s0 + $0x78] sm:$0xff] }
 0x5bf   :  { %3216 = vst.sshfl [vmem:[%s4420_s4 + $0xd] sm:$0x1 pattern:$0x73625140] %v2197_v59  ;;  %2819 = vmatprep.subr.bf16.mxu0 %v3952_v35  ;;  %2860 = vmatprep.subr.bf16.mxu1 %v3957_v0 }
 0x5c0   :  { %3217 = vst.sshfl [vmem:[%s4420_s4 + $0x25] sm:$0x1 pattern:$0x73625140] %v2196_v58  ;;  %2849 = vmatprep.mubr.bf16.mxu0 %v3473_v1  ;;  %v2226_v40 = vrot.slane %v2198_v60, %v3745_v44  ;;  %v2228_v41 = vcombine.high %v2212_v38, %v2212_v38  ;;  %v2229_v63 = vcombine.high %v2219_v62, %v2219_v62  ;;  %2241 = vst [vmem:[%s4420_s4 + $0x15] sm:$0x1] %v2227_v39 }
 0x5c1   :  { %3218 = vst.sshfl [vmem:[%s4420_s4 + $0x2d] sm:$0x1 pattern:$0x73625140] %v2198_v60  ;;  %2890 = vmatprep.mubr.bf16.mxu1 %v3473_v1  ;;  %2820 = vmatpush1.bf16.msra.mxu0 %v3962_v42  ;;  %v3219_v1 = vld [vmem:[%s4418_s0 + $0x60] sm:$0xff]  ;;  %v2621_v58 = vunpack.c.h.bf16 %v3257_v56 }
 0x5c2   :  { %2861 = vmatpush1.bf16.msra.mxu1 %v3967_v3  ;;  %v2230_v35 = vcombine.high %v2226_v40, %v2226_v40  ;;  %2242 = vst [vmem:[%s4420_s4 + $0x1d] sm:$0x1] %v2229_v63  ;;  %2245 = vst [vmem:[%s4420_s4 + $0x35] sm:$0x1] %v2228_v41  ;;  %2821 = vmatprep.subr.bf16.mxu0 %v3976_v2  ;;  %v2250_v0 = vunpack.c.l.bf16 %v3219_v1  ;;  %v2251_v42 = vunpack.c.h.bf16 %v3219_v1  ;;  %v3220_v2 = vld [vmem:[%s4418_s0 + $0x68] sm:$0xff]  ;;  %v2622_v41 = vunpack.c.l.bf16 %v3258_v61 }
 0x5c3   :  { %2862 = vmatprep.subr.bf16.mxu1 %v3981_v4 }
 0x5c4   :  { %2246 = vst [vmem:[%s4420_s4 + $0x3d] sm:$0x1] %v2230_v35 }
 0x5c5   :  { %2822 = vmatpush1.bf16.msra.mxu0 %v3986_v43 }
 0x5c6   :  { %2863 = vmatpush1.bf16.msra.mxu1 %v3991_v5  ;;  %2823 = vmatprep.subr.bf16.mxu0 %v4000_v6 }
 0x5c7   :  { %2864 = vmatprep.subr.bf16.mxu1 %v4005_v7 }
 0x5c9   :  { %2824 = vmatpush1.bf16.msra.mxu0 %v4010_v8  ;;  %v2252_v8 = vunpack.c.l.bf16 %v3220_v2 }
 0x5ca   :  { %2865 = vmatpush1.bf16.msra.mxu1 %v4015_v9  ;;  %2825 = vmatprep.subr.bf16.mxu0 %v4024_v10 }
 0x5cb   :  { %2866 = vmatprep.subr.bf16.mxu1 %v4029_v11 }
 0x5cd   :  { %2826 = vmatpush1.bf16.msra.mxu0 %v4034_v12 }
 0x5ce   :  { %2867 = vmatpush1.bf16.msra.mxu1 %v4039_v13  ;;  %2827 = vmatprep.subr.bf16.mxu0 %v4048_v14 }
 0x5cf   :  { %2868 = vmatprep.subr.bf16.mxu1 %v4053_v15 }
 0x5d1   :  { %2828 = vmatpush1.bf16.msra.mxu0 %v4058_v16  ;;  %v2253_v16 = vunpack.c.h.bf16 %v3220_v2 }
 0x5d2   :  { %2869 = vmatpush1.bf16.msra.mxu1 %v4063_v17  ;;  %2829 = vmatprep.subr.bf16.mxu0 %v4072_v18 }
 0x5d3   :  { %2870 = vmatprep.subr.bf16.mxu1 %v4077_v19 }
 0x5d5   :  { %2830 = vmatpush1.bf16.msra.mxu0 %v4082_v20 }
 0x5d6   :  { %2871 = vmatpush1.bf16.msra.mxu1 %v4087_v21  ;;  %2831 = vmatprep.subr.bf16.mxu0 %v4096_v22 }
 0x5d7   :  { %2872 = vmatprep.subr.bf16.mxu1 %v4101_v23 }
 0x5d9   :  { %2832 = vmatpush1.bf16.msra.mxu0 %v4106_v24 }
 0x5da   :  { %2873 = vmatpush1.bf16.msra.mxu1 %v4111_v25 }
 0x67c   :  { %v2481_v3 = vpop.f32.mrf.mxu0 }
 0x67d   :  { %v2522_v4 = vpop.f32.mrf.mxu1  ;;  %v2529_v43 = vadd.f32 %v2481_v3, %v2250_v0 }
 0x67e   :  { %v2483_v5 = vpop.f32.mrf.mxu0  ;;  %v2531_v15 = vadd.f32 %v2522_v4, %v2252_v8  ;;  %v2623_v4 = vunpack.c.h.bf16 %v3258_v61 }
 0x67f   :  { %v2524_v6 = vpop.f32.mrf.mxu1  ;;  %v2533_v7 = vmul.f32 0.5, %v2529_v43  ;;  %v2530_v9 = vadd.f32 %v2483_v5, %v2251_v42 }
 0x680   :  { %v2485_v10 = vpop.f32.mrf.mxu0  ;;  %v2532_v17 = vadd.f32 %v2524_v6, %v2253_v16 }
 0x681   :  { %v2526_v11 = vpop.f32.mrf.mxu1  ;;  %3453 = vtanh.f32 %v2533_v7  ;;  %v2537_v12 = vmul.f32 0.5, %v2530_v9 }
 0x682   :  { %v2486_v13 = vpop.f32.mrf.mxu0  ;;  %v2542_v18 = vmul.f32 0.5, %v2532_v17 }
 0x683   :  { %v2527_v14 = vpop.f32.mrf.mxu1  ;;  %3455 = vtanh.f32 %v2537_v12 }
 0x684   :  { %3457 = vtanh.f32 %v2531_v15 }
 0x685   :  { %3459 = vtanh.f32 %v2542_v18 }
 0x68e   :  { %v3454_v19 = vpop.eup %3453 }
 0x68f   :  { %v2535_v20 = vmul.f32 0.5, %v3454_v19 }
 0x690   :  { %v3456_v21 = vpop.eup %3455 }
 0x691   :  { %v2536_v22 = vadd.f32 0.5, %v2535_v20  ;;  %v2539_v23 = vmul.f32 0.5, %v3456_v21  ;;  %v3458_v25 = vpop.eup %3457 }
 0x692   :  { %v3460_v37 = vpop.eup %3459 }
 0x693   :  { %v2540_v24 = vadd.f32 0.5, %v2539_v23  ;;  %v2547_v34 = vmul.f32 %v3458_v25, %v2536_v22  ;;  %v2544_v26 = vmul.f32 0.5, %v3460_v37 }
 0x695   :  { %v2546_v32 = vmul.f32 %v2540_v24, %v4274_v50  ;;  %v2545_v28 = vadd.f32 0.5, %v2544_v26 }
 0x697   :  { %v4346_v36 = vadd.f32 %v2547_v34, %v2546_v32 }
 0x699   :  { %3461 = vtanh.f32 %v4346_v36 }
 0x6a6   :  { %v3462_v29 = vpop.eup %3461 }
 0x6a7   :  { %v2550_v30 = vmul.f32 %v3462_v29, %v2545_v28 }
 0x6a9   :  { %v2552_v27 = vcombine.high %v2550_v30, %v2550_v30  ;;  %v2559_v31 = vrot.slane %v2550_v30, %v3745_v44  ;;  %v2624_v33 = vpack.c.bf16 %v2550_v30, %v2550_v30 }
 0x6ab   :  { %v2566_v45 = vrot.slane %v2552_v27, %v3745_v44  ;;  %v2567_v46 = vcombine.high %v2559_v31, %v2559_v31  ;;  %v2575_v47 = vrot.slane %v2559_v31, %v3745_v44  ;;  %3253 = vst.sshfl [vmem:[%s4420_s4 + $0x6] sm:$0x1 pattern:$0x73625140] %v2559_v31  ;;  %2850 = vmatmul.mubr.bf16.vlgmr.msra.gmra.mxu0 %v2624_v33 }
 0x6ac   :  { %2891 = vmatmul.mubr.bf16.vlgmr.msra.gmra.mxu1 %v2624_v33 }
 0x6ad   :  { %v2568_v49 = vcombine.high %v2566_v45, %v2566_v45  ;;  %v2582_v50 = vrot.slane %v2566_v45, %v3745_v44  ;;  %v2589_v51 = vrot.slane %v2567_v46, %v3745_v44  ;;  %v2597_v48 = vcombine.high %v2575_v47, %v2575_v47  ;;  %3254 = vst.sshfl [vmem:[%s4420_s4 + $0xe] sm:$0x1 pattern:$0x73625140] %v2567_v46 }
 0x6ae   :  { %3255 = vst.sshfl [vmem:[%s4420_s4 + $0x26] sm:$0x1 pattern:$0x73625140] %v2566_v45 }
 0x6af   :  { %v2596_v52 = vrot.slane %v2568_v49, %v3745_v44  ;;  %v2598_v53 = vcombine.high %v2582_v50, %v2582_v50  ;;  %v2599_v54 = vcombine.high %v2589_v51, %v2589_v51  ;;  %2611 = vst [vmem:[%s4420_s4 + $0x16] sm:$0x1] %v2597_v48  ;;  %3256 = vst.sshfl [vmem:[%s4420_s4 + $0x2e] sm:$0x1 pattern:$0x73625140] %v2568_v49 }
 0x6b1   :  { %v2600_v55 = vcombine.high %v2596_v52, %v2596_v52  ;;  %2612 = vst [vmem:[%s4420_s4 + $0x1e] sm:$0x1] %v2599_v54  ;;  %2615 = vst [vmem:[%s4420_s4 + $0x36] sm:$0x1] %v2598_v53 }
 0x6b3   :  { %2616 = vst [vmem:[%s4420_s4 + $0x3e] sm:$0x1] %v2600_v55 }
 0x76b   :  { %v2851_v59 = vpop.f32.mrf.mxu0 }
 0x76c   :  { %v2892_v60 = vpop.f32.mrf.mxu1  ;;  %v2899_v38 = vadd.f32 %v2851_v59, %v2620_v57 }
 0x76d   :  { %v2853_v62 = vpop.f32.mrf.mxu0  ;;  %v2901_v2 = vadd.f32 %v2892_v60, %v2622_v41 }
 0x76e   :  { %v2894_v39 = vpop.f32.mrf.mxu1  ;;  %v2903_v40 = vmul.f32 0.5, %v2899_v38  ;;  %v2900_v63 = vadd.f32 %v2853_v62, %v2621_v58 }
 0x76f   :  { %v2855_v35 = vpop.f32.mrf.mxu0  ;;  %v2902_v43 = vadd.f32 %v2894_v39, %v2623_v4 }
 0x770   :  { %v2896_v1 = vpop.f32.mrf.mxu1  ;;  %3463 = vtanh.f32 %v2903_v40  ;;  %v2907_v0 = vmul.f32 0.5, %v2900_v63 }
 0x771   :  { %v2856_v42 = vpop.f32.mrf.mxu0  ;;  %v2912_v5 = vmul.f32 0.5, %v2902_v43 }
 0x772   :  { %v2897_v3 = vpop.f32.mrf.mxu1  ;;  %3465 = vtanh.f32 %v2907_v0 }
 0x773   :  { %3467 = vtanh.f32 %v2901_v2 }
 0x774   :  { %3469 = vtanh.f32 %v2912_v5 }
 0x77d   :  { %v3464_v6 = vpop.eup %3463 }
 0x77e   :  { %v2905_v7 = vmul.f32 0.5, %v3464_v6 }
 0x77f   :  { %v3466_v8 = vpop.eup %3465 }
 0x780   :  { %v2906_v9 = vadd.f32 0.5, %v2905_v7  ;;  %v2909_v10 = vmul.f32 0.5, %v3466_v8  ;;  %v3468_v12 = vpop.eup %3467 }
 0x781   :  { %v3470_v16 = vpop.eup %3469 }
 0x782   :  { %v2910_v11 = vadd.f32 0.5, %v2909_v10  ;;  %v2917_v14 = vmul.f32 %v3468_v12, %v2906_v9  ;;  %v2914_v17 = vmul.f32 0.5, %v3470_v16 }
 0x784   :  { %v2916_v13 = vmul.f32 %v2910_v11, %v4346_v36  ;;  %v2915_v18 = vadd.f32 0.5, %v2914_v17 }
 0x786   :  { %v2918_v15 = vadd.f32 %v2917_v14, %v2916_v13 }
 0x788   :  { %3471 = vtanh.f32 %v2918_v15 }
 0x795   :  { %v3472_v19 = vpop.eup %3471 }
 0x796   :  { %v2920_v20 = vmul.f32 %v3472_v19, %v2915_v18 }
 0x798   :  { %v2922_v21 = vcombine.high %v2920_v20, %v2920_v20  ;;  %v2929_v22 = vrot.slane %v2920_v20, %v3745_v44 }
 0x79a   :  { %v2936_v23 = vrot.slane %v2922_v21, %v3745_v44  ;;  %v2937_v24 = vcombine.high %v2929_v22, %v2929_v22  ;;  %v2945_v25 = vrot.slane %v2929_v22, %v3745_v44  ;;  %3291 = vst.sshfl [vmem:[%s4420_s4 + $0x7] sm:$0x1 pattern:$0x73625140] %v2929_v22 }
 0x79c   :  { %v2938_v32 = vcombine.high %v2936_v23, %v2936_v23  ;;  %v2952_v34 = vrot.slane %v2936_v23, %v3745_v44  ;;  %v2959_v36 = vrot.slane %v2937_v24, %v3745_v44  ;;  %v2967_v37 = vcombine.high %v2945_v25, %v2945_v25  ;;  %3292 = vst.sshfl [vmem:[%s4420_s4 + $0xf] sm:$0x1 pattern:$0x73625140] %v2937_v24 }
 0x79d   :  { %3293 = vst.sshfl [vmem:[%s4420_s4 + $0x27] sm:$0x1 pattern:$0x73625140] %v2936_v23 }
 0x79e   :  { %v2966_v26 = vrot.slane %v2938_v32, %v3745_v44  ;;  %v2968_v28 = vcombine.high %v2952_v34, %v2952_v34  ;;  %v2969_v29 = vcombine.high %v2959_v36, %v2959_v36  ;;  %2981 = vst [vmem:[%s4420_s4 + $0x17] sm:$0x1] %v2967_v37  ;;  %3294 = vst.sshfl [vmem:[%s4420_s4 + $0x2f] sm:$0x1 pattern:$0x73625140] %v2938_v32 }
 0x7a0   :  { %v2970_v30 = vcombine.high %v2966_v26, %v2966_v26  ;;  %2982 = vst [vmem:[%s4420_s4 + $0x1f] sm:$0x1] %v2969_v29  ;;  %2985 = vst [vmem:[%s4420_s4 + $0x37] sm:$0x1] %v2968_v28 }
 0x7a2   :  { %2986 = vst [vmem:[%s4420_s4 + $0x3f] sm:$0x1] %v2970_v30 }

</bundles_post_ra>
